<compile_context>
chip_gen: v7x
topology: tpu7x:2x2x1
jax: 0.10.0
libtpu: 0.0.40
codegen_flags: <defaults>
</compile_context>

<pallas_src>
import functools
import math

import jax
import jax.numpy as jnp
import numpy as np
from jax.experimental import pallas as pl
from jax.experimental.pallas import tpu as pltpu

BN_EPS = 1e-5
LANE = 128
M_TARGET = 256        # target flattened rows per matmul chunk


def _round_up(x, m):
    return (x + m - 1) // m * m


# ----------------------------------------------------------------------------
# Pallas kernel: fused 3x3 conv (folded sparse+UV+BN weight) + bias
#                (+ shortcut) (+ ReLU), all operands 2-D / lane-dense.
# ----------------------------------------------------------------------------
def _fused_conv3x3_kernel(*refs, taps, pw, ho, row_chunk, relu, shortcut):
    """One grid step = one image x one lane-tile of the output channels.

    Ref layouts (all 2-D slabs, no in-kernel reshapes):
      x_ref   (1, P, L, C)   P flattened input planes (P=1 stride-1, P=4 stride-2 parity)
      w_ref   (9, C, tn)     folded per-tap weight (bf16)
      b_ref   (1, tn)        folded BN bias (f32)
      shortcut == "identity": sc_ref (1, ho*pw, tn)
      shortcut == "proj"    : sc_ref (1, ho*pw, c_sc), scw_ref (c_sc, tn), scb_ref (1, tn)
      out_ref (1, ho*pw, tn) output at *padded* width pw (junk cols sliced off outside)

    taps: 9 static (plane_index, flat_offset) pairs; tap (kh,kw) of output row r,
    flattened position q = r*pw + c, reads x_ref[0, plane, offset + q, :].
    """
    if shortcut == "none":
        x_ref, w_ref, b_ref, out_ref = refs
    elif shortcut == "identity":
        x_ref, w_ref, b_ref, sc_ref, out_ref = refs
    else:  # "proj"
        x_ref, w_ref, b_ref, sc_ref, scw_ref, scb_ref, out_ref = refs

    bias = b_ref[...]                                            # (1, tn) f32

    for r0 in range(0, ho, row_chunk):                           # few, large chunks
        tr = min(row_chunk, ho - r0)
        m = tr * pw
        lo = r0 * pw
        acc = None
        for t, (p, off) in enumerate(taps):                      # 9 chained bf16 matmuls
            xs = x_ref[0, p, off + lo:off + lo + m, :]           # contiguous, no reshape
            y = jnp.dot(xs, w_ref[t], preferred_element_type=jnp.float32)
            acc = y if acc is None else acc + y
        acc = acc + bias                                         # bias once, post-chain
        if shortcut == "identity":
            acc = acc + sc_ref[0, lo:lo + m, :].astype(jnp.float32)
        elif shortcut == "proj":
            acc = acc + jnp.dot(sc_ref[0, lo:lo + m, :], scw_ref[...],
                                preferred_element_type=jnp.float32)
            acc = acc + scb_ref[...]
        if relu:
            acc = jnp.maximum(acc, 0.0)
        out_ref[0, lo:lo + m, :] = acc.astype(out_ref.dtype)


def _fused_conv3x3(x_planes, w, b, *, ho, pw, taps, relu, shortcut="none",
                   sc=None, sc_w=None, sc_b=None):
    n, P, L, C = x_planes.shape
    cpad = w.shape[-1]                     # multiple of 128 (lane-dense output)
    tn = 256 if cpad % 256 == 0 else 128   # wider N-tile for v6e/v7x 256-deep MXU
    tn = min(tn, cpad)
    m_out = ho * pw
    row_chunk = max(1, min(ho, M_TARGET // pw))

    in_specs = [pl.BlockSpec((1, P, L, C), lambda i, j: (i, 0, 0, 0)),
                pl.BlockSpec((9, C, tn), lambda i, j: (0, 0, j)),
                pl.BlockSpec((1, tn), lambda i, j: (0, j))]
    args = [x_planes, w, b]
    sc_bytes = 0
    if shortcut == "identity":
        in_specs.append(pl.BlockSpec((1, m_out, tn), lambda i, j: (i, 0, j)))
        args.append(sc)
        sc_bytes = m_out * tn * 2
    elif shortcut == "proj":
        in_specs += [pl.BlockSpec((1, m_out, sc.shape[-1]), lambda i, j: (i, 0, 0)),
                     pl.BlockSpec((sc_w.shape[0], tn), lambda i, j: (0, j)),
                     pl.BlockSpec((1, tn), lambda i, j: (0, j))]
        args += [sc, sc_w, sc_b]
        sc_bytes = m_out * sc.shape[-1] * 2 + sc_w.shape[0] * tn * 2 + 4 * tn

    kernel = functools.partial(_fused_conv3x3_kernel, taps=taps, pw=pw, ho=ho,
                               row_chunk=row_chunk, relu=relu, shortcut=shortcut)

    # Explicit VMEM budget (double-buffered blocks + headroom), capped for v7x's 64 MiB.
    blk_bytes = P * L * C * 2 + 9 * C * tn * 2 + m_out * tn * 2 + 4 * tn + sc_bytes
    vmem_limit = min(64 << 20, max(32 << 20, 2 * blk_bytes + (8 << 20)))

    return pl.pallas_call(
        kernel,
        out_shape=jax.ShapeDtypeStruct((n, m_out, cpad), jnp.bfloat16),
        grid=(n, cpad // tn),
        in_specs=in_specs,
        out_specs=pl.BlockSpec((1, m_out, tn), lambda i, j: (i, 0, j)),
        compiler_params=pltpu.CompilerParams(
            dimension_semantics=("parallel", "parallel"),
            vmem_limit_bytes=vmem_limit),
    )(*args)


# ----------------------------------------------------------------------------
# Trace-time folding: sparse + V@U (doping) and eval-mode BatchNorm
# ----------------------------------------------------------------------------
def _fold_doped_conv_bn(conv_p, bn_p, c_in_pad, c_out_pad):
    v2d = conv_p['v_w'][:, :, 0, 0]                                   # (O, R)
    w_eff = conv_p['sparse_w'] + jnp.einsum('or,rikl->oikl', v2d, conv_p['u_w'])
    scale = bn_p['gamma'] * jax.lax.rsqrt(bn_p['var'] + BN_EPS)
    w_bn = w_eff * scale[:, None, None, None]
    b_bn = bn_p['beta'] - bn_p['mean'] * scale
    o, i = w_bn.shape[:2]
    w_mat = jnp.transpose(w_bn, (2, 3, 1, 0)).reshape(9, i, o)        # (tap, in, out)
    w_mat = jnp.pad(w_mat, ((0, 0), (0, c_in_pad - i), (0, c_out_pad - o)))
    b_vec = jnp.pad(b_bn, (0, c_out_pad - o)).reshape(1, c_out_pad)
    return w_mat.astype(jnp.bfloat16), b_vec.astype(jnp.float32)


def _fold_shortcut_bn(w_1x1, bn_p, c_out_pad):
    scale = bn_p['gamma'] * jax.lax.rsqrt(bn_p['var'] + BN_EPS)
    w = (w_1x1[:, :, 0, 0] * scale[:, None]).T                        # (in, out)
    b = bn_p['beta'] - bn_p['mean'] * scale
    w = jnp.pad(w, ((0, 0), (0, c_out_pad - w.shape[1])))
    b = jnp.pad(b, (0, c_out_pad - b.shape[0])).reshape(1, c_out_pad)
    return w.astype(jnp.bfloat16), b.astype(jnp.float32)


# ----------------------------------------------------------------------------
# BlockISOFlopDoping forward
# ----------------------------------------------------------------------------
@functools.partial(jax.jit, static_argnames=("downsample",))
def block_iso_flop_doping_forward(x_nchw, params, *, downsample):
    n, c_in, h, w = x_nchw.shape
    f_out = params['conv1']['sparse_w'].shape[0]
    cpad = _round_up(f_out, LANE)
    stride = 2 if downsample else 1
    ho = (h - 1) // stride + 1
    wo = (w - 1) // stride + 1

    x = jnp.transpose(x_nchw, (0, 2, 3, 1)).astype(jnp.bfloat16)       # NHWC, bf16
    # TODO(synk): for real ResNet widths, padding c_in to a lane multiple is a
    #             measurable K-efficiency tradeoff; left unpadded for these tiny shapes.

    # ---- stage 1: relu( BN1( sparse1(x) + V1(U1(x)) ) ) -----------------------
    w1, b1 = _fold_doped_conv_bn(params['conv1'], params['bn1'], c_in, cpad)
    if stride == 1:
        pw1 = wo + 2
        # pad to (ho+3, wo+2): conv pad (1,1) plus one extra zero row of flattening slack
        xp = jnp.pad(x, ((0, 0), (1, 2), (1, 1), (0, 0)))
        planes1 = xp.reshape(n, 1, (ho + 3) * pw1, c_in)
        taps1 = tuple((0, kh * pw1 + kw) for kh in range(3) for kw in range(3))
    else:
        pw1 = wo + 1
        hq, wq = 2 * (ho + 2), 2 * (wo + 1)
        xpe = jnp.pad(x, ((0, 0), (1, hq - h - 1), (1, wq - w - 1), (0, 0)))
        # parity planes: plane[ph*2+pw][i, j] = padded_x[2i+ph, 2j+pw]  (1x input size)
        planes1 = jnp.transpose(
            xpe.reshape(n, ho + 2, 2, wo + 1, 2, c_in),
            (0, 2, 4, 1, 3, 5)).reshape(n, 4, (ho + 2) * pw1, c_in)
        taps1 = tuple(((kh % 2) * 2 + (kw % 2), (kh // 2) * pw1 + (kw // 2))
                      for kh in range(3) for kw in range(3))
    out1 = _fused_conv3x3(planes1, w1, b1, ho=ho, pw=pw1, taps=taps1,
                          relu=True)                                  # (n, ho*pw1, cpad) bf16

    # ---- stage 2: relu( BN2( sparse2(o1) + V2(U2(o1)) ) + shortcut(x) ) -------
    w2, b2 = _fold_doped_conv_bn(params['conv2'], params['bn2'], cpad, cpad)
    pw2 = wo + 2
    o1 = out1.reshape(n, ho, pw1, cpad)[:, :, :wo, :]                 # drop junk cols
    xp2 = jnp.pad(o1, ((0, 0), (1, 2), (1, 1), (0, 0)))
    planes2 = xp2.reshape(n, 1, (ho + 3) * pw2, cpad)
    taps2 = tuple((0, kh * pw2 + kw) for kh in range(3) for kw in range(3))

    if downsample or c_in != f_out:
        # Projection shortcut: 1x1 conv, stride 2 (hard-coded in the nn.Module), + folded BN.
        # NOTE: downsample=False with c_in != f_out is shape-inconsistent in the original
        #       PyTorch module as well; only downsample=True is meaningfully supported here.
        sc = x[:, ::2, ::2, :]                                        # (n, ho, wo, c_in)
        sc = jnp.pad(sc, ((0, 0), (0, 0), (0, pw2 - wo), (0, 0)))
        sc = sc.reshape(n, ho * pw2, c_in)
        sc_w, sc_b = _fold_shortcut_bn(params['shortcut_w'], params['bn_s'], cpad)
        out2 = _fused_conv3x3(planes2, w2, b2, ho=ho, pw=pw2, taps=taps2, relu=True,
                              shortcut="proj", sc=sc, sc_w=sc_w, sc_b=sc_b)
    else:
        sc = jnp.pad(x, ((0, 0), (0, 0), (0, pw2 - wo), (0, cpad - c_in)))
        out2 = _fused_conv3x3(planes2, w2, b2, ho=ho, pw=pw2, taps=taps2, relu=True,
                              shortcut="identity", sc=sc.reshape(n, ho * pw2, cpad))

    # valid-column slice + channel slice + NCHW transpose + f32 cast fuse into one pass
    out2 = out2.reshape(n, ho, pw2, cpad)[:, :, :wo, :f_out]
    return jnp.transpose(out2, (0, 3, 1, 2)).astype(jnp.float32)


# ----------------------------------------------------------------------------
# Deterministic parameter init (shapes match the nn.Module __init__)
# ----------------------------------------------------------------------------
def _isoflop_rank(f_in, f_out, sparsity):
    return int(math.floor(sparsity * (3 * 3 * f_in * f_out) / (3 * 3 * f_in + f_out)))


def init_params(key, f_in, f_out, downsample, sparsity):
    keys = iter(jax.random.split(key, 8))

    def doped_conv(k, ci, co):
        rank = _isoflop_rank(ci, co, sparsity)
        assert rank >= 1, "pick a sparsity level that yields rank >= 1"
        k1, k2, k3 = jax.random.split(k, 3)
        bound = 1.0 / math.sqrt(ci * 9)
        return dict(
            sparse_w=jax.random.uniform(k1, (co, ci, 3, 3), jnp.float32, -bound, bound),
            u_w=jax.random.normal(k2, (rank, ci, 3, 3), jnp.float32)
            * math.sqrt(2.0 / (rank * 9)),                 # kaiming_normal, fan_out
            v_w=jax.random.normal(k3, (co, rank, 1, 1), jnp.float32)
            * math.sqrt(2.0 / co),                         # kaiming_normal, fan_out
        )

    def bn_params(k, c):
        k1, k2, k3, k4 = jax.random.split(k, 4)
        return dict(gamma=jax.random.uniform(k1, (c,), jnp.float32, 0.5, 1.5),
                    beta=0.1 * jax.random.normal(k2, (c,), jnp.float32),
                    mean=0.1 * jax.random.normal(k3, (c,), jnp.float32),
                    var=jax.random.uniform(k4, (c,), jnp.float32, 0.5, 1.5))

    params = dict(conv1=doped_conv(next(keys), f_in, f_out),
                  bn1=bn_params(next(keys), f_out),
                  conv2=doped_conv(next(keys), f_out, f_out),
                  bn2=bn_params(next(keys), f_out))
    if downsample or f_in != f_out:
        bound = 1.0 / math.sqrt(f_in)
        params['shortcut_w'] = jax.random.uniform(next(keys), (f_out, f_in, 1, 1),
                                                  jnp.float32, -bound, bound)
        params['bn_s'] = bn_params(next(keys), f_out)
    return params


# ----------------------------------------------------------------------------
# Pure-JAX reference (eval-mode BN), used only for the correctness check
# ----------------------------------------------------------------------------
def reference_forward(x_nchw, params, *, downsample):
    def conv(x, w, s, pad):
        return jax.lax.conv_general_dilated(
            x, w, (s, s), ((pad, pad), (pad, pad)),
            dimension_numbers=('NCHW', 'OIHW', 'NCHW'))

    def doped(x, p, s):
        sparse_out = conv(x, p['sparse_w'], s, 1)
        lowrank = conv(conv(x, p['u_w'], s, 1), p['v_w'], 1, 0)
        return sparse_out + lowrank

    def bn(x, p):
        return ((x - p['mean'][None, :, None, None])
                * jax.lax.rsqrt(p['var'][None, :, None, None] + BN_EPS)
                * p['gamma'][None, :, None, None]
                + p['beta'][None, :, None, None])

    stride = 2 if downsample else 1
    out = jax.nn.relu(bn(doped(x_nchw, params['conv1'], stride), params['bn1']))
    out = bn(doped(out, params['conv2'], 1), params['bn2'])
    c_in, f_out = x_nchw.shape[1], params['conv1']['sparse_w'].shape[0]
    if downsample or c_in != f_out:
        sc = bn(conv(x_nchw, params['shortcut_w'], 2, 0), params['bn_s'])
    else:
        sc = x_nchw
    return jax.nn.relu(out + sc)


def _assert_close(out, ref, name, tol=3e-2):
    # Tolerance scaled to the output magnitude: bf16 inputs/weights/outputs, f32 accumulation.
    out = np.asarray(out, dtype=np.float32)
    ref = np.asarray(ref, dtype=np.float32)
    err = float(np.max(np.abs(out - ref)))
    bound = tol * float(np.max(np.abs(ref))) + tol
    assert err <= bound, f"{name}: max |err| {err:.4f} > allowed {bound:.4f}"


# ----------------------------------------------------------------------------
if __name__ == "__main__":
    key = jax.random.PRNGKey(0)
    kx1, kx2, kp1, kp2 = jax.random.split(key, 4)
    sparsity = 0.5            # gives rank >= 1 at these small channel counts

    # Config A: downsample + channel expansion -> projection shortcut (stride-2 conv1).
    n, f_in, f_out, hw = 2, 4, 8, 16
    x_a = jax.random.normal(kx1, (n, f_in, hw, hw), jnp.float32)
    params_a = init_params(kp1, f_in, f_out, downsample=True, sparsity=sparsity)
    out_a = jax.block_until_ready(
        block_iso_flop_doping_forward(x_a, params_a, downsample=True))
    assert out_a.shape == (n, f_out, hw // 2, hw // 2)
    _assert_close(out_a, reference_forward(x_a, params_a, downsample=True),
                  "downsample/proj-shortcut")

    # Config B: f_in == f_out, no downsampling -> identity shortcut.
    x_b = jax.random.normal(kx2, (n, f_out, hw, hw), jnp.float32)
    params_b = init_params(kp2, f_out, f_out, downsample=False, sparsity=sparsity)
    out_b = jax.block_until_ready(
        block_iso_flop_doping_forward(x_b, params_b, downsample=False))
    assert out_b.shape == (n, f_out, hw, hw)
    _assert_close(out_b, reference_forward(x_b, params_b, downsample=False),
                  "identity-shortcut")

    print("KERNEL_OK")
</pallas_src>

<mosaic_0001>
module attributes {stable_mosaic.version = 11 : i64} {
  func.func @_fused_conv3x3_kernel(%arg0: i32, %arg1: i32, %arg2: memref<1x4x90x4xbf16, #tpu.memory_space<vmem>>, %arg3: memref<9x4x128xbf16, #tpu.memory_space<vmem>>, %arg4: memref<1x128xf32, #tpu.memory_space<vmem>>, %arg5: memref<1x72x128xbf16, #tpu.memory_space<vmem>>) attributes {dimension_semantics = [#tpu.dimension_semantics<parallel>, #tpu.dimension_semantics<parallel>], iteration_bounds = array<i64: 2, 1>, scalar_prefetch = 0 : i64, scratch_operands = 0 : i64, tpu.core_type = #tpu.core_type<tc>, window_params = [{transform_indices = @transform_0, window_bounds = array<i64: 1, 4, 90, 4>}, {transform_indices = @transform_1, window_bounds = array<i64: 9, 4, 128>}, {transform_indices = @transform_2, window_bounds = array<i64: 1, 128>}, {transform_indices = @transform_3, window_bounds = array<i64: 1, 72, 128>}]} {
    %c0 = arith.constant 0 : index
    %c0_0 = arith.constant 0 : index
    %0 = vector.load %arg4[%c0, %c0_0] : memref<1x128xf32, #tpu.memory_space<vmem>>, vector<1x128xf32>
    %c0_1 = arith.constant 0 : index
    %c0_2 = arith.constant 0 : index
    %c0_3 = arith.constant 0 : index
    %c0_4 = arith.constant 0 : index
    %1 = vector.load %arg2[%c0_1, %c0_2, %c0_3, %c0_4] : memref<1x4x90x4xbf16, #tpu.memory_space<vmem>>, vector<1x1x72x4xbf16>
    %2 = vector.shape_cast %1 : vector<1x1x72x4xbf16> to vector<72x4xbf16>
    %c0_5 = arith.constant 0 : index
    %c0_6 = arith.constant 0 : index
    %c0_7 = arith.constant 0 : index
    %3 = vector.load %arg3[%c0_5, %c0_6, %c0_7] : memref<9x4x128xbf16, #tpu.memory_space<vmem>>, vector<1x4x128xbf16>
    %4 = vector.shape_cast %3 : vector<1x4x128xbf16> to vector<4x128xbf16>
    %cst = arith.constant dense<0.000000e+00> : vector<72x128xf32>
    %5 = tpu.matmul %2, %4, %cst {dimension_numbers = #tpu.dot_dimension_numbers<[1], [0], [0], [1], [0, 0, 1, 1], [], []>} : vector<72x4xbf16>, vector<4x128xbf16>, vector<72x128xf32> -> vector<72x128xf32>
    %c0_8 = arith.constant 0 : index
    %c1 = arith.constant 1 : index
    %c0_9 = arith.constant 0 : index
    %c0_10 = arith.constant 0 : index
    %6 = vector.load %arg2[%c0_8, %c1, %c0_9, %c0_10] : memref<1x4x90x4xbf16, #tpu.memory_space<vmem>>, vector<1x1x72x4xbf16>
    %7 = vector.shape_cast %6 : vector<1x1x72x4xbf16> to vector<72x4xbf16>
    %c1_11 = arith.constant 1 : index
    %c0_12 = arith.constant 0 : index
    %c0_13 = arith.constant 0 : index
    %8 = vector.load %arg3[%c1_11, %c0_12, %c0_13] : memref<9x4x128xbf16, #tpu.memory_space<vmem>>, vector<1x4x128xbf16>
    %9 = vector.shape_cast %8 : vector<1x4x128xbf16> to vector<4x128xbf16>
    %cst_14 = arith.constant dense<0.000000e+00> : vector<72x128xf32>
    %10 = tpu.matmul %7, %9, %cst_14 {dimension_numbers = #tpu.dot_dimension_numbers<[1], [0], [0], [1], [0, 0, 1, 1], [], []>} : vector<72x4xbf16>, vector<4x128xbf16>, vector<72x128xf32> -> vector<72x128xf32>
    %11 = arith.addf %5, %10 : vector<72x128xf32>
    %c0_15 = arith.constant 0 : index
    %c0_16 = arith.constant 0 : index
    %c1_17 = arith.constant 1 : index
    %c0_18 = arith.constant 0 : index
    %12 = vector.load %arg2[%c0_15, %c0_16, %c1_17, %c0_18] : memref<1x4x90x4xbf16, #tpu.memory_space<vmem>>, vector<1x1x72x4xbf16>
    %13 = vector.shape_cast %12 : vector<1x1x72x4xbf16> to vector<72x4xbf16>
    %c2 = arith.constant 2 : index
    %c0_19 = arith.constant 0 : index
    %c0_20 = arith.constant 0 : index
    %14 = vector.load %arg3[%c2, %c0_19, %c0_20] : memref<9x4x128xbf16, #tpu.memory_space<vmem>>, vector<1x4x128xbf16>
    %15 = vector.shape_cast %14 : vector<1x4x128xbf16> to vector<4x128xbf16>
    %cst_21 = arith.constant dense<0.000000e+00> : vector<72x128xf32>
    %16 = tpu.matmul %13, %15, %cst_21 {dimension_numbers = #tpu.dot_dimension_numbers<[1], [0], [0], [1], [0, 0, 1, 1], [], []>} : vector<72x4xbf16>, vector<4x128xbf16>, vector<72x128xf32> -> vector<72x128xf32>
    %17 = arith.addf %11, %16 : vector<72x128xf32>
    %c0_22 = arith.constant 0 : index
    %c2_23 = arith.constant 2 : index
    %c0_24 = arith.constant 0 : index
    %c0_25 = arith.constant 0 : index
    %18 = vector.load %arg2[%c0_22, %c2_23, %c0_24, %c0_25] : memref<1x4x90x4xbf16, #tpu.memory_space<vmem>>, vector<1x1x72x4xbf16>
    %19 = vector.shape_cast %18 : vector<1x1x72x4xbf16> to vector<72x4xbf16>
    %c3 = arith.constant 3 : index
    %c0_26 = arith.constant 0 : index
    %c0_27 = arith.constant 0 : index
    %20 = vector.load %arg3[%c3, %c0_26, %c0_27] : memref<9x4x128xbf16, #tpu.memory_space<vmem>>, vector<1x4x128xbf16>
    %21 = vector.shape_cast %20 : vector<1x4x128xbf16> to vector<4x128xbf16>
    %cst_28 = arith.constant dense<0.000000e+00> : vector<72x128xf32>
    %22 = tpu.matmul %19, %21, %cst_28 {dimension_numbers = #tpu.dot_dimension_numbers<[1], [0], [0], [1], [0, 0, 1, 1], [], []>} : vector<72x4xbf16>, vector<4x128xbf16>, vector<72x128xf32> -> vector<72x128xf32>
    %23 = arith.addf %17, %22 : vector<72x128xf32>
    %c0_29 = arith.constant 0 : index
    %c3_30 = arith.constant 3 : index
    %c0_31 = arith.constant 0 : index
    %c0_32 = arith.constant 0 : index
    %24 = vector.load %arg2[%c0_29, %c3_30, %c0_31, %c0_32] : memref<1x4x90x4xbf16, #tpu.memory_space<vmem>>, vector<1x1x72x4xbf16>
    %25 = vector.shape_cast %24 : vector<1x1x72x4xbf16> to vector<72x4xbf16>
    %c4 = arith.constant 4 : index
    %c0_33 = arith.constant 0 : index
    %c0_34 = arith.constant 0 : index
    %26 = vector.load %arg3[%c4, %c0_33, %c0_34] : memref<9x4x128xbf16, #tpu.memory_space<vmem>>, vector<1x4x128xbf16>
    %27 = vector.shape_cast %26 : vector<1x4x128xbf16> to vector<4x128xbf16>
    %cst_35 = arith.constant dense<0.000000e+00> : vector<72x128xf32>
    %28 = tpu.matmul %25, %27, %cst_35 {dimension_numbers = #tpu.dot_dimension_numbers<[1], [0], [0], [1], [0, 0, 1, 1], [], []>} : vector<72x4xbf16>, vector<4x128xbf16>, vector<72x128xf32> -> vector<72x128xf32>
    %29 = arith.addf %23, %28 : vector<72x128xf32>
    %c0_36 = arith.constant 0 : index
    %c2_37 = arith.constant 2 : index
    %c1_38 = arith.constant 1 : index
    %c0_39 = arith.constant 0 : index
    %30 = vector.load %arg2[%c0_36, %c2_37, %c1_38, %c0_39] : memref<1x4x90x4xbf16, #tpu.memory_space<vmem>>, vector<1x1x72x4xbf16>
    %31 = vector.shape_cast %30 : vector<1x1x72x4xbf16> to vector<72x4xbf16>
    %c5 = arith.constant 5 : index
    %c0_40 = arith.constant 0 : index
    %c0_41 = arith.constant 0 : index
    %32 = vector.load %arg3[%c5, %c0_40, %c0_41] : memref<9x4x128xbf16, #tpu.memory_space<vmem>>, vector<1x4x128xbf16>
    %33 = vector.shape_cast %32 : vector<1x4x128xbf16> to vector<4x128xbf16>
    %cst_42 = arith.constant dense<0.000000e+00> : vector<72x128xf32>
    %34 = tpu.matmul %31, %33, %cst_42 {dimension_numbers = #tpu.dot_dimension_numbers<[1], [0], [0], [1], [0, 0, 1, 1], [], []>} : vector<72x4xbf16>, vector<4x128xbf16>, vector<72x128xf32> -> vector<72x128xf32>
    %35 = arith.addf %29, %34 : vector<72x128xf32>
    %c0_43 = arith.constant 0 : index
    %c0_44 = arith.constant 0 : index
    %c9 = arith.constant 9 : index
    %c0_45 = arith.constant 0 : index
    %36 = vector.load %arg2[%c0_43, %c0_44, %c9, %c0_45] : memref<1x4x90x4xbf16, #tpu.memory_space<vmem>>, vector<1x1x72x4xbf16>
    %37 = vector.shape_cast %36 : vector<1x1x72x4xbf16> to vector<72x4xbf16>
    %c6 = arith.constant 6 : index
    %c0_46 = arith.constant 0 : index
    %c0_47 = arith.constant 0 : index
    %38 = vector.load %arg3[%c6, %c0_46, %c0_47] : memref<9x4x128xbf16, #tpu.memory_space<vmem>>, vector<1x4x128xbf16>
    %39 = vector.shape_cast %38 : vector<1x4x128xbf16> to vector<4x128xbf16>
    %cst_48 = arith.constant dense<0.000000e+00> : vector<72x128xf32>
    %40 = tpu.matmul %37, %39, %cst_48 {dimension_numbers = #tpu.dot_dimension_numbers<[1], [0], [0], [1], [0, 0, 1, 1], [], []>} : vector<72x4xbf16>, vector<4x128xbf16>, vector<72x128xf32> -> vector<72x128xf32>
    %41 = arith.addf %35, %40 : vector<72x128xf32>
    %c0_49 = arith.constant 0 : index
    %c1_50 = arith.constant 1 : index
    %c9_51 = arith.constant 9 : index
    %c0_52 = arith.constant 0 : index
    %42 = vector.load %arg2[%c0_49, %c1_50, %c9_51, %c0_52] : memref<1x4x90x4xbf16, #tpu.memory_space<vmem>>, vector<1x1x72x4xbf16>
    %43 = vector.shape_cast %42 : vector<1x1x72x4xbf16> to vector<72x4xbf16>
    %c7 = arith.constant 7 : index
    %c0_53 = arith.constant 0 : index
    %c0_54 = arith.constant 0 : index
    %44 = vector.load %arg3[%c7, %c0_53, %c0_54] : memref<9x4x128xbf16, #tpu.memory_space<vmem>>, vector<1x4x128xbf16>
    %45 = vector.shape_cast %44 : vector<1x4x128xbf16> to vector<4x128xbf16>
    %cst_55 = arith.constant dense<0.000000e+00> : vector<72x128xf32>
    %46 = tpu.matmul %43, %45, %cst_55 {dimension_numbers = #tpu.dot_dimension_numbers<[1], [0], [0], [1], [0, 0, 1, 1], [], []>} : vector<72x4xbf16>, vector<4x128xbf16>, vector<72x128xf32> -> vector<72x128xf32>
    %47 = arith.addf %41, %46 : vector<72x128xf32>
    %c0_56 = arith.constant 0 : index
    %c0_57 = arith.constant 0 : index
    %c10 = arith.constant 10 : index
    %c0_58 = arith.constant 0 : index
    %48 = vector.load %arg2[%c0_56, %c0_57, %c10, %c0_58] : memref<1x4x90x4xbf16, #tpu.memory_space<vmem>>, vector<1x1x72x4xbf16>
    %49 = vector.shape_cast %48 : vector<1x1x72x4xbf16> to vector<72x4xbf16>
    %c8 = arith.constant 8 : index
    %c0_59 = arith.constant 0 : index
    %c0_60 = arith.constant 0 : index
    %50 = vector.load %arg3[%c8, %c0_59, %c0_60] : memref<9x4x128xbf16, #tpu.memory_space<vmem>>, vector<1x4x128xbf16>
    %51 = vector.shape_cast %50 : vector<1x4x128xbf16> to vector<4x128xbf16>
    %cst_61 = arith.constant dense<0.000000e+00> : vector<72x128xf32>
    %52 = tpu.matmul %49, %51, %cst_61 {dimension_numbers = #tpu.dot_dimension_numbers<[1], [0], [0], [1], [0, 0, 1, 1], [], []>} : vector<72x4xbf16>, vector<4x128xbf16>, vector<72x128xf32> -> vector<72x128xf32>
    %53 = arith.addf %47, %52 : vector<72x128xf32>
    %54 = vector.broadcast %0 : vector<1x128xf32> to vector<72x128xf32>
    %55 = arith.addf %53, %54 : vector<72x128xf32>
    %cst_62 = arith.constant 0.000000e+00 : f32
    %56 = vector.broadcast %cst_62 : f32 to vector<72x128xf32>
    %57 = arith.maximumf %55, %56 : vector<72x128xf32>
    %58 = arith.truncf %57 : vector<72x128xf32> to vector<72x128xbf16>
    %c0_63 = arith.constant 0 : index
    %c0_64 = arith.constant 0 : index
    %c0_65 = arith.constant 0 : index
    %59 = vector.load %arg5[%c0_63, %c0_64, %c0_65] : memref<1x72x128xbf16, #tpu.memory_space<vmem>>, vector<1x72x128xbf16>
    %60 = vector.shape_cast %59 : vector<1x72x128xbf16> to vector<72x128xbf16>
    %61 = vector.shape_cast %58 : vector<72x128xbf16> to vector<1x72x128xbf16>
    tpu.vector_store %arg5[%c0_63, %c0_64, %c0_65], %61 {strides = array<i32>} : memref<1x72x128xbf16, #tpu.memory_space<vmem>>, vector<1x72x128xbf16>,
    return
  }
  func.func @transform_0(%arg0: i32, %arg1: i32) -> (i32, i32, i32, i32) {
    %c0_i32 = arith.constant 0 : i32
    %c0_i32_0 = arith.constant 0 : i32
    %c0_i32_1 = arith.constant 0 : i32
    %c0_i32_2 = arith.constant 0 : i32
    return %arg0, %c0_i32, %c0_i32_0, %c0_i32_1 : i32, i32, i32, i32
  }
  func.func @transform_1(%arg0: i32, %arg1: i32) -> (i32, i32, i32) {
    %c0_i32 = arith.constant 0 : i32
    %c0_i32_0 = arith.constant 0 : i32
    %c0_i32_1 = arith.constant 0 : i32
    return %c0_i32, %c0_i32_0, %arg1 : i32, i32, i32
  }
  func.func @transform_2(%arg0: i32, %arg1: i32) -> (i32, i32) {
    %c0_i32 = arith.constant 0 : i32
    %c0_i32_0 = arith.constant 0 : i32
    return %c0_i32, %arg1 : i32, i32
  }
  func.func @transform_3(%arg0: i32, %arg1: i32) -> (i32, i32, i32) {
    %c0_i32 = arith.constant 0 : i32
    %c0_i32_0 = arith.constant 0 : i32
    return %arg0, %c0_i32, %arg1 : i32, i32, i32
  }
}

module attributes {stable_mosaic.version = 11 : i64} {
  func.func @_fused_conv3x3_kernel(%arg0: i32, %arg1: i32, %arg2: memref<1x1x110x128xbf16, #tpu.memory_space<vmem>>, %arg3: memref<9x128x128xbf16, #tpu.memory_space<vmem>>, %arg4: memref<1x128xf32, #tpu.memory_space<vmem>>, %arg5: memref<1x80x4xbf16, #tpu.memory_space<vmem>>, %arg6: memref<4x128xbf16, #tpu.memory_space<vmem>>, %arg7: memref<1x128xf32, #tpu.memory_space<vmem>>, %arg8: memref<1x80x128xbf16, #tpu.memory_space<vmem>>) attributes {dimension_semantics = [#tpu.dimension_semantics<parallel>, #tpu.dimension_semantics<parallel>], iteration_bounds = array<i64: 2, 1>, scalar_prefetch = 0 : i64, scratch_operands = 0 : i64, tpu.core_type = #tpu.core_type<tc>, window_params = [{transform_indices = @transform_0, window_bounds = array<i64: 1, 1, 110, 128>}, {transform_indices = @transform_1, window_bounds = array<i64: 9, 128, 128>}, {transform_indices = @transform_2, window_bounds = array<i64: 1, 128>}, {transform_indices = @transform_3, window_bounds = array<i64: 1, 80, 4>}, {transform_indices = @transform_4, window_bounds = array<i64: 4, 128>}, {transform_indices = @transform_5, window_bounds = array<i64: 1, 128>}, {transform_indices = @transform_6, window_bounds = array<i64: 1, 80, 128>}]} {
    %c0 = arith.constant 0 : index
    %c0_0 = arith.constant 0 : index
    %0 = vector.load %arg4[%c0, %c0_0] : memref<1x128xf32, #tpu.memory_space<vmem>>, vector<1x128xf32>
    %c0_1 = arith.constant 0 : index
    %c0_2 = arith.constant 0 : index
    %c0_3 = arith.constant 0 : index
    %c0_4 = arith.constant 0 : index
    %1 = vector.load %arg2[%c0_1, %c0_2, %c0_3, %c0_4] : memref<1x1x110x128xbf16, #tpu.memory_space<vmem>>, vector<1x1x80x128xbf16>
    %2 = vector.shape_cast %1 : vector<1x1x80x128xbf16> to vector<80x128xbf16>
    %c0_5 = arith.constant 0 : index
    %c0_6 = arith.constant 0 : index
    %c0_7 = arith.constant 0 : index
    %3 = vector.load %arg3[%c0_5, %c0_6, %c0_7] : memref<9x128x128xbf16, #tpu.memory_space<vmem>>, vector<1x128x128xbf16>
    %4 = vector.shape_cast %3 : vector<1x128x128xbf16> to vector<128x128xbf16>
    %cst = arith.constant dense<0.000000e+00> : vector<80x128xf32>
    %5 = tpu.matmul %2, %4, %cst {dimension_numbers = #tpu.dot_dimension_numbers<[1], [0], [0], [1], [0, 0, 1, 1], [], []>} : vector<80x128xbf16>, vector<128x128xbf16>, vector<80x128xf32> -> vector<80x128xf32>
    %c0_8 = arith.constant 0 : index
    %c0_9 = arith.constant 0 : index
    %c1 = arith.constant 1 : index
    %c0_10 = arith.constant 0 : index
    %6 = vector.load %arg2[%c0_8, %c0_9, %c1, %c0_10] : memref<1x1x110x128xbf16, #tpu.memory_space<vmem>>, vector<1x1x80x128xbf16>
    %7 = vector.shape_cast %6 : vector<1x1x80x128xbf16> to vector<80x128xbf16>
    %c1_11 = arith.constant 1 : index
    %c0_12 = arith.constant 0 : index
    %c0_13 = arith.constant 0 : index
    %8 = vector.load %arg3[%c1_11, %c0_12, %c0_13] : memref<9x128x128xbf16, #tpu.memory_space<vmem>>, vector<1x128x128xbf16>
    %9 = vector.shape_cast %8 : vector<1x128x128xbf16> to vector<128x128xbf16>
    %cst_14 = arith.constant dense<0.000000e+00> : vector<80x128xf32>
    %10 = tpu.matmul %7, %9, %cst_14 {dimension_numbers = #tpu.dot_dimension_numbers<[1], [0], [0], [1], [0, 0, 1, 1], [], []>} : vector<80x128xbf16>, vector<128x128xbf16>, vector<80x128xf32> -> vector<80x128xf32>
    %11 = arith.addf %5, %10 : vector<80x128xf32>
    %c0_15 = arith.constant 0 : index
    %c0_16 = arith.constant 0 : index
    %c2 = arith.constant 2 : index
    %c0_17 = arith.constant 0 : index
    %12 = vector.load %arg2[%c0_15, %c0_16, %c2, %c0_17] : memref<1x1x110x128xbf16, #tpu.memory_space<vmem>>, vector<1x1x80x128xbf16>
    %13 = vector.shape_cast %12 : vector<1x1x80x128xbf16> to vector<80x128xbf16>
    %c2_18 = arith.constant 2 : index
    %c0_19 = arith.constant 0 : index
    %c0_20 = arith.constant 0 : index
    %14 = vector.load %arg3[%c2_18, %c0_19, %c0_20] : memref<9x128x128xbf16, #tpu.memory_space<vmem>>, vector<1x128x128xbf16>
    %15 = vector.shape_cast %14 : vector<1x128x128xbf16> to vector<128x128xbf16>
    %cst_21 = arith.constant dense<0.000000e+00> : vector<80x128xf32>
    %16 = tpu.matmul %13, %15, %cst_21 {dimension_numbers = #tpu.dot_dimension_numbers<[1], [0], [0], [1], [0, 0, 1, 1], [], []>} : vector<80x128xbf16>, vector<128x128xbf16>, vector<80x128xf32> -> vector<80x128xf32>
    %17 = arith.addf %11, %16 : vector<80x128xf32>
    %c0_22 = arith.constant 0 : index
    %c0_23 = arith.constant 0 : index
    %c10 = arith.constant 10 : index
    %c0_24 = arith.constant 0 : index
    %18 = vector.load %arg2[%c0_22, %c0_23, %c10, %c0_24] : memref<1x1x110x128xbf16, #tpu.memory_space<vmem>>, vector<1x1x80x128xbf16>
    %19 = vector.shape_cast %18 : vector<1x1x80x128xbf16> to vector<80x128xbf16>
    %c3 = arith.constant 3 : index
    %c0_25 = arith.constant 0 : index
    %c0_26 = arith.constant 0 : index
    %20 = vector.load %arg3[%c3, %c0_25, %c0_26] : memref<9x128x128xbf16, #tpu.memory_space<vmem>>, vector<1x128x128xbf16>
    %21 = vector.shape_cast %20 : vector<1x128x128xbf16> to vector<128x128xbf16>
    %cst_27 = arith.constant dense<0.000000e+00> : vector<80x128xf32>
    %22 = tpu.matmul %19, %21, %cst_27 {dimension_numbers = #tpu.dot_dimension_numbers<[1], [0], [0], [1], [0, 0, 1, 1], [], []>} : vector<80x128xbf16>, vector<128x128xbf16>, vector<80x128xf32> -> vector<80x128xf32>
    %23 = arith.addf %17, %22 : vector<80x128xf32>
    %c0_28 = arith.constant 0 : index
    %c0_29 = arith.constant 0 : index
    %c11 = arith.constant 11 : index
    %c0_30 = arith.constant 0 : index
    %24 = vector.load %arg2[%c0_28, %c0_29, %c11, %c0_30] : memref<1x1x110x128xbf16, #tpu.memory_space<vmem>>, vector<1x1x80x128xbf16>
    %25 = vector.shape_cast %24 : vector<1x1x80x128xbf16> to vector<80x128xbf16>
    %c4 = arith.constant 4 : index
    %c0_31 = arith.constant 0 : index
    %c0_32 = arith.constant 0 : index
    %26 = vector.load %arg3[%c4, %c0_31, %c0_32] : memref<9x128x128xbf16, #tpu.memory_space<vmem>>, vector<1x128x128xbf16>
    %27 = vector.shape_cast %26 : vector<1x128x128xbf16> to vector<128x128xbf16>
    %cst_33 = arith.constant dense<0.000000e+00> : vector<80x128xf32>
    %28 = tpu.matmul %25, %27, %cst_33 {dimension_numbers = #tpu.dot_dimension_numbers<[1], [0], [0], [1], [0, 0, 1, 1], [], []>} : vector<80x128xbf16>, vector<128x128xbf16>, vector<80x128xf32> -> vector<80x128xf32>
    %29 = arith.addf %23, %28 : vector<80x128xf32>
    %c0_34 = arith.constant 0 : index
    %c0_35 = arith.constant 0 : index
    %c12 = arith.constant 12 : index
    %c0_36 = arith.constant 0 : index
    %30 = vector.load %arg2[%c0_34, %c0_35, %c12, %c0_36] : memref<1x1x110x128xbf16, #tpu.memory_space<vmem>>, vector<1x1x80x128xbf16>
    %31 = vector.shape_cast %30 : vector<1x1x80x128xbf16> to vector<80x128xbf16>
    %c5 = arith.constant 5 : index
    %c0_37 = arith.constant 0 : index
    %c0_38 = arith.constant 0 : index
    %32 = vector.load %arg3[%c5, %c0_37, %c0_38] : memref<9x128x128xbf16, #tpu.memory_space<vmem>>, vector<1x128x128xbf16>
    %33 = vector.shape_cast %32 : vector<1x128x128xbf16> to vector<128x128xbf16>
    %cst_39 = arith.constant dense<0.000000e+00> : vector<80x128xf32>
    %34 = tpu.matmul %31, %33, %cst_39 {dimension_numbers = #tpu.dot_dimension_numbers<[1], [0], [0], [1], [0, 0, 1, 1], [], []>} : vector<80x128xbf16>, vector<128x128xbf16>, vector<80x128xf32> -> vector<80x128xf32>
    %35 = arith.addf %29, %34 : vector<80x128xf32>
    %c0_40 = arith.constant 0 : index
    %c0_41 = arith.constant 0 : index
    %c20 = arith.constant 20 : index
    %c0_42 = arith.constant 0 : index
    %36 = vector.load %arg2[%c0_40, %c0_41, %c20, %c0_42] : memref<1x1x110x128xbf16, #tpu.memory_space<vmem>>, vector<1x1x80x128xbf16>
    %37 = vector.shape_cast %36 : vector<1x1x80x128xbf16> to vector<80x128xbf16>
    %c6 = arith.constant 6 : index
    %c0_43 = arith.constant 0 : index
    %c0_44 = arith.constant 0 : index
    %38 = vector.load %arg3[%c6, %c0_43, %c0_44] : memref<9x128x128xbf16, #tpu.memory_space<vmem>>, vector<1x128x128xbf16>
    %39 = vector.shape_cast %38 : vector<1x128x128xbf16> to vector<128x128xbf16>
    %cst_45 = arith.constant dense<0.000000e+00> : vector<80x128xf32>
    %40 = tpu.matmul %37, %39, %cst_45 {dimension_numbers = #tpu.dot_dimension_numbers<[1], [0], [0], [1], [0, 0, 1, 1], [], []>} : vector<80x128xbf16>, vector<128x128xbf16>, vector<80x128xf32> -> vector<80x128xf32>
    %41 = arith.addf %35, %40 : vector<80x128xf32>
    %c0_46 = arith.constant 0 : index
    %c0_47 = arith.constant 0 : index
    %c21 = arith.constant 21 : index
    %c0_48 = arith.constant 0 : index
    %42 = vector.load %arg2[%c0_46, %c0_47, %c21, %c0_48] : memref<1x1x110x128xbf16, #tpu.memory_space<vmem>>, vector<1x1x80x128xbf16>
    %43 = vector.shape_cast %42 : vector<1x1x80x128xbf16> to vector<80x128xbf16>
    %c7 = arith.constant 7 : index
    %c0_49 = arith.constant 0 : index
    %c0_50 = arith.constant 0 : index
    %44 = vector.load %arg3[%c7, %c0_49, %c0_50] : memref<9x128x128xbf16, #tpu.memory_space<vmem>>, vector<1x128x128xbf16>
    %45 = vector.shape_cast %44 : vector<1x128x128xbf16> to vector<128x128xbf16>
    %cst_51 = arith.constant dense<0.000000e+00> : vector<80x128xf32>
    %46 = tpu.matmul %43, %45, %cst_51 {dimension_numbers = #tpu.dot_dimension_numbers<[1], [0], [0], [1], [0, 0, 1, 1], [], []>} : vector<80x128xbf16>, vector<128x128xbf16>, vector<80x128xf32> -> vector<80x128xf32>
    %47 = arith.addf %41, %46 : vector<80x128xf32>
    %c0_52 = arith.constant 0 : index
    %c0_53 = arith.constant 0 : index
    %c22 = arith.constant 22 : index
    %c0_54 = arith.constant 0 : index
    %48 = vector.load %arg2[%c0_52, %c0_53, %c22, %c0_54] : memref<1x1x110x128xbf16, #tpu.memory_space<vmem>>, vector<1x1x80x128xbf16>
    %49 = vector.shape_cast %48 : vector<1x1x80x128xbf16> to vector<80x128xbf16>
    %c8 = arith.constant 8 : index
    %c0_55 = arith.constant 0 : index
    %c0_56 = arith.constant 0 : index
    %50 = vector.load %arg3[%c8, %c0_55, %c0_56] : memref<9x128x128xbf16, #tpu.memory_space<vmem>>, vector<1x128x128xbf16>
    %51 = vector.shape_cast %50 : vector<1x128x128xbf16> to vector<128x128xbf16>
    %cst_57 = arith.constant dense<0.000000e+00> : vector<80x128xf32>
    %52 = tpu.matmul %49, %51, %cst_57 {dimension_numbers = #tpu.dot_dimension_numbers<[1], [0], [0], [1], [0, 0, 1, 1], [], []>} : vector<80x128xbf16>, vector<128x128xbf16>, vector<80x128xf32> -> vector<80x128xf32>
    %53 = arith.addf %47, %52 : vector<80x128xf32>
    %54 = vector.broadcast %0 : vector<1x128xf32> to vector<80x128xf32>
    %55 = arith.addf %53, %54 : vector<80x128xf32>
    %c0_58 = arith.constant 0 : index
    %c0_59 = arith.constant 0 : index
    %c0_60 = arith.constant 0 : index
    %56 = vector.load %arg5[%c0_58, %c0_59, %c0_60] : memref<1x80x4xbf16, #tpu.memory_space<vmem>>, vector<1x80x4xbf16>
    %57 = vector.shape_cast %56 : vector<1x80x4xbf16> to vector<80x4xbf16>
    %c0_61 = arith.constant 0 : index
    %c0_62 = arith.constant 0 : index
    %58 = vector.load %arg6[%c0_61, %c0_62] : memref<4x128xbf16, #tpu.memory_space<vmem>>, vector<4x128xbf16>
    %cst_63 = arith.constant dense<0.000000e+00> : vector<80x128xf32>
    %59 = tpu.matmul %57, %58, %cst_63 {dimension_numbers = #tpu.dot_dimension_numbers<[1], [0], [0], [1], [0, 0, 1, 1], [], []>} : vector<80x4xbf16>, vector<4x128xbf16>, vector<80x128xf32> -> vector<80x128xf32>
    %60 = arith.addf %55, %59 : vector<80x128xf32>
    %c0_64 = arith.constant 0 : index
    %c0_65 = arith.constant 0 : index
    %61 = vector.load %arg7[%c0_64, %c0_65] : memref<1x128xf32, #tpu.memory_space<vmem>>, vector<1x128xf32>
    %62 = vector.broadcast %61 : vector<1x128xf32> to vector<80x128xf32>
    %63 = arith.addf %60, %62 : vector<80x128xf32>
    %cst_66 = arith.constant 0.000000e+00 : f32
    %64 = vector.broadcast %cst_66 : f32 to vector<80x128xf32>
    %65 = arith.maximumf %63, %64 : vector<80x128xf32>
    %66 = arith.truncf %65 : vector<80x128xf32> to vector<80x128xbf16>
    %c0_67 = arith.constant 0 : index
    %c0_68 = arith.constant 0 : index
    %c0_69 = arith.constant 0 : index
    %67 = vector.load %arg8[%c0_67, %c0_68, %c0_69] : memref<1x80x128xbf16, #tpu.memory_space<vmem>>, vector<1x80x128xbf16>
    %68 = vector.shape_cast %67 : vector<1x80x128xbf16> to vector<80x128xbf16>
    %69 = vector.shape_cast %66 : vector<80x128xbf16> to vector<1x80x128xbf16>
    tpu.vector_store %arg8[%c0_67, %c0_68, %c0_69], %69 {strides = array<i32>} : memref<1x80x128xbf16, #tpu.memory_space<vmem>>, vector<1x80x128xbf16>,
    return
  }
  func.func @transform_0(%arg0: i32, %arg1: i32) -> (i32, i32, i32, i32) {
    %c0_i32 = arith.constant 0 : i32
    %c0_i32_0 = arith.constant 0 : i32
    %c0_i32_1 = arith.constant 0 : i32
    %c0_i32_2 = arith.constant 0 : i32
    return %arg0, %c0_i32, %c0_i32_0, %c0_i32_1 : i32, i32, i32, i32
  }
  func.func @transform_1(%arg0: i32, %arg1: i32) -> (i32, i32, i32) {
    %c0_i32 = arith.constant 0 : i32
    %c0_i32_0 = arith.constant 0 : i32
    %c0_i32_1 = arith.constant 0 : i32
    return %c0_i32, %c0_i32_0, %arg1 : i32, i32, i32
  }
  func.func @transform_2(%arg0: i32, %arg1: i32) -> (i32, i32) {
    %c0_i32 = arith.constant 0 : i32
    %c0_i32_0 = arith.constant 0 : i32
    return %c0_i32, %arg1 : i32, i32
  }
  func.func @transform_3(%arg0: i32, %arg1: i32) -> (i32, i32, i32) {
    %c0_i32 = arith.constant 0 : i32
    %c0_i32_0 = arith.constant 0 : i32
    %c0_i32_1 = arith.constant 0 : i32
    return %arg0, %c0_i32, %c0_i32_0 : i32, i32, i32
  }
  func.func @transform_4(%arg0: i32, %arg1: i32) -> (i32, i32) {
    %c0_i32 = arith.constant 0 : i32
    %c0_i32_0 = arith.constant 0 : i32
    return %c0_i32, %arg1 : i32, i32
  }
  func.func @transform_5(%arg0: i32, %arg1: i32) -> (i32, i32) {
    %c0_i32 = arith.constant 0 : i32
    %c0_i32_0 = arith.constant 0 : i32
    return %c0_i32, %arg1 : i32, i32
  }
  func.func @transform_6(%arg0: i32, %arg1: i32) -> (i32, i32, i32) {
    %c0_i32 = arith.constant 0 : i32
    %c0_i32_0 = arith.constant 0 : i32
    return %arg0, %c0_i32, %arg1 : i32, i32, i32
  }
}

</mosaic_0001>

<bundles_post_ra>
// kernel: block_iso_flop_doping_forward.2
= control target key start
LH: loop header
LB: loop body
LE: loop exit
PB: predicated region body
PF: predicated region fallthrough
CT: control target
= control target key end

     0   :  { %s2296_s12 = smov 0   ;;  %s2298_s13 = smov 0   ;;  %s2703_s0 = inlined_call_operand.vmem [shape: bf16[2,4,90,4], index: 0, kind: input, shape index: {}]   ;;  %s2704_s1 = inlined_call_operand.vmem [shape: bf16[9,4,128], index: 1, kind: input, shape index: {}]   ;;  %s2705_s2 = inlined_call_operand.vmem [shape: f32[1,128], index: 2, kind: input, shape index: {}]   ;;  %s2706_s3 = inlined_call_operand.vmem [shape: bf16[2,72,128], index: 3, kind: output, shape index: {}]  }
   0x1   :  { %s2300_s14 = smov 0  }
   0x2 LB: > { %s25_s15 = sadd.s32 1, %s2268_s13  ;;  %p1739_p0 = scmp.ge.s32.totalorder %s2272_s14, 1  ;;  %s2272_s14 = sphi %s2300_s14, %s13_s14   ;;  %s2268_s13 = sphi %s2298_s13, %s2708_s13   ;;  %s2264_s12 = sphi %s2296_s12, %s2707_s12  }
   0x3   : > { %p27_p1 = scmp.ge.s32.totalorder %s25_s15, 2  ;;  %p168_p2 = scmp.lt.s32.totalorder %s2272_s14, 3 }
   0x5   : > { %s2710_s15 = smov (%p27_p1, %s25_s15), 0  ;;  %p169_p3 = pnand %p1739_p0, %p168_p2 }
   0x6   : > { %v1751_v0 = vld [vmem:[%s2704_s1 + $0x2] sm:$0x3] (!%p169_p3)  ;;  %vm285_vm0 = vcmask (!%p169_p3), 1041408   ;;  %p202_p4 = scmp.lt.s32.totalorder (!%p169_p3), %s2264_s12, 1  ;;  %v2274_v1 = vmov (!%p169_p3), 0.0   ;;  %vm2275_vm1 = vmmov (!%p169_p3), 0  }
   0x7   : > { %172 = sbr.rel (%p169_p3) target bundleno = 416 (0x1a0), region = 32  ;;  %1981 = vmatprep.subr.bf16.mxu0 (!%p169_p3), %v2274_v1  ;;  %2179 = vmatprep.subr.bf16.mxu1 (!%p169_p3), %v2274_v1  ;;  %v287_v2 = vsel (!%p169_p3), %vm285_vm0, %v1751_v0, 0  ;;  %v1772_v3 = vld [vmem:[%s2704_s1 + $0x4] sm:$0x3] (!%p169_p3)  ;;  %v233_v4 = vld [vmem:[%s2704_s1] sm:$0x3] (!%p169_p3) }
   0x8   : > { %1982 = vmatpush3.bf16.msra.mxu0 (!%p169_p3), %v287_v2  ;;  %2180 = vmatpush3.bf16.msra.mxu1 (!%p169_p3), %v287_v2  ;;  %vm269_vm2 = vcmask (!%p169_p3), 31744   ;;  %v567_v6 = vsel (!%p169_p3), %vm285_vm0, %v1772_v3, 0  ;;  %v400_v8 = vsel (!%p169_p3), %vm285_vm0, %v233_v4, 0  ;;  %v1792_v15 = vld [vmem:[%s2704_s1 + $0x6] sm:$0x3] (!%p169_p3)  ;;  %vm1449_vm4 = vcmask (!%p169_p3), 1046528  }
   0x9   : > { %1983 = vmatprep.mubr.msk.bf16.mxu0 (!%p169_p3), %vm2275_vm1, %v2274_v1  ;;  %1995 = vmatprep.mubr.msk.bf16.mxu1 (!%p169_p3), %vm2275_vm1, %v2274_v1  ;;  %v701_v20 = vsel (!%p169_p3), %vm285_vm0, %v1792_v15, 0  ;;  %vm511_vm3 = vsmask.f32 (!%p169_p3), 7424  ;;  %v1812_v25 = vld [vmem:[%s2704_s1 + $0x8] sm:$0x3] (!%p169_p3) }
   0xa   : > { %2025 = vmatprep.subr.bf16.mxu0 (!%p169_p3), %v2274_v1  ;;  %2003 = vmatprep.subr.bf16.mxu1 (!%p169_p3), %v2274_v1  ;;  %v835_v31 = vsel (!%p169_p3), %vm285_vm0, %v1812_v25, 0 }
   0xe   : > { %s2712_s12 = smov (!%p202_p4, %s2264_s12), 1 }
   0xf   : > { %s2181_s18 = smul.u32 192, %s2712_s12 }
  0x10   : > { %s2182_s17 = smul.u32 36, %s2712_s12 }
  0x11   : > { %s2338_s25 = scalar_lea.vmem %s2703_s0, %s2181_s18 }
  0x12   : > { %v2209_v5 = vld [vmem:[%s2338_s25 + $0x30] sm:$0xff]   ;;  %v2210_v7 = vld [vmem:[%s2338_s25 + $0x48] sm:$0xff]   ;;  %v2211_v9 = vld [vmem:[%s2338_s25 + $0x38] sm:$0xff]   ;;  %s2678_s20 = scalar_lea.vmem %s2706_s3, %s2182_s17 }
  0x13   : > { %1984 = vmatmul.mubr.msk.bf16.vlgmr.msra.gmra.mrb[0].mxu0 %vm269_vm2, %v2209_v5  ;;  %1996 = vmatmul.mubr.msk.bf16.vlgmr.msra.gmra.mrb[0].mxu1 %vm269_vm2, %v2210_v7  ;;  %v2212_v10 = vld [vmem:[%s2338_s25 + $0x50] ss:$0 sps:$4 sm:$0xff]   ;;  %v2216_v11 = vld [vmem:[%s2338_s25] sm:$0xff]   ;;  %v2217_v12 = vld [vmem:[%s2338_s25 + $0x8] sm:$0xff]  }
  0x14   : > { %2026 = vmatpush3.bf16.msra.mxu0 %v567_v6  ;;  %2004 = vmatpush3.bf16.msra.mxu1 %v400_v8  ;;  %v515_v13 = vshll.u32 %v2216_v11, 16  ;;  %v2213_v14 = vld [vmem:[%s2338_s25 + $0x40] sm:$0xff]   ;;  %v513_v17 = vshrl.u32 %v2216_v11, 16  ;;  %v520_v19 = vshll.u32 %v2217_v12, 16  ;;  %v2369_v21 = vld [vmem:[%s2338_s25 + $0x10] sm:$0xff]   ;;  %v2376_v24 = vld [vmem:[%s2338_s25 + $0x18] sm:$0xff]  }
  0x15   : > { %1987 = vmatprep.mubr.msk.bf16.mxu0 %vm2275_vm1, %v2274_v1  ;;  %1999 = vmatprep.mubr.msk.bf16.mxu1 %vm2275_vm1, %v2274_v1  ;;  %v2214_v16 = vld [vmem:[%s2338_s25] sm:$0xff]   ;;  %v2215_v26 = vld [vmem:[%s2338_s25 + $0x8] sm:$0xff]   ;;  %v528_v27 = vshll.u32 %v2369_v21, 16  ;;  %v524_v29 = vshrl.u32 %v2217_v12, 16  ;;  %v536_v30 = vshll.u32 %v2376_v24, 16  ;;  %v532_v32 = vshrl.u32 %v2369_v21, 16 }
  0x16   : > { %2047 = vmatprep.subr.bf16.mxu1 %v2274_v1  ;;  %2069 = vmatprep.subr.bf16.mxu0 %v2274_v1  ;;  %v517_v18 = vrot.slane %v515_v13, 1  ;;  %v522_v23 = vrot.slane %v520_v19, 1  ;;  %v540_v34 = vshrl.u32 %v2376_v24, 16  ;;  %v2234_v35 = vld [vmem:[%s2338_s25 + $0x60] sm:$0xff]   ;;  %v2235_v36 = vld [vmem:[%s2338_s25 + $0x68] sm:$0xff]   ;;  %v2236_v39 = vld [vmem:[%s2338_s25 + $0x70] sm:$0xff]  }
  0x17   : > { %v530_v33 = vrot.slane %v528_v27, 1  ;;  %v2395_v38 = vrot.slane %v536_v30, 1  ;;  %v956_v40 = vshrl.u32 %v2234_v35, 16  ;;  %v958_v41 = vshll.u32 %v2234_v35, 16  ;;  %v1093_v44 = vld [vmem:[%s2338_s25 + $0x4] sm:$0xf] }
  0x18   : > { %v518_v22 = vor.u32 %v517_v18, %v513_v17  ;;  %v526_v37 = vor.u32 %v524_v29, %v522_v23  ;;  %v963_v42 = vshll.u32 %v2235_v36, 16  ;;  %v967_v43 = vshrl.u32 %v2235_v36, 16  ;;  %v2218_v45 = vld [vmem:[%s2338_s25 + $0x10] sm:$0xff]   ;;  %v2406_v47 = vld [vmem:[%s2338_s25 + $0x8] sm:$0xf]  ;;  %v2239_v56 = vld [vmem:[%s2338_s25 + $0x78] sm:$0xff]  }
  0x19   : > { %v971_v46 = vshll.u32 %v2236_v39, 16  ;;  %v2409_v48 = vld [vmem:[%s2338_s25 + $0xc] sm:$0xff]   ;;  %v2412_v49 = vld [vmem:[%s2338_s25 + $0x20] sm:$0x1f]   ;;  %v960_v50 = vrot.slane %v958_v41, 1  ;;  %v1845_v52 = vcombine.low %v1093_v44, %v2406_v47  ;;  %v975_v57 = vshrl.u32 %v2236_v39, 16 }
  0x1a   : > { %v523_v28 = vsel %vm511_vm3, %v518_v22, %v522_v23  ;;  %v965_v51 = vrot.slane %v963_v42, 1  ;;  %v531_v53 = vsel %vm511_vm3, %v526_v37, %v530_v33  ;;  %v1138_v55 = vshll.u32 %v2409_v48, 16  ;;  %v2419_v2 = vld [vmem:[%s2338_s25 + $0x14] sm:$0xff]   ;;  %v2430_v7 = vld [vmem:[%s2338_s25 + $0x80] sm:$0x1f]  }
  0x1b   : > { %1988 = vmatmul.mubr.msk.bf16.gmra.mrb[4].mxu0 %vm269_vm2, %v2211_v9  ;;  %2000 = vmatmul.mubr.msk.bf16.gmra.mrb[4].mxu1 %vm269_vm2, %v2212_v10  ;;  %v973_v54 = vrot.slane %v971_v46, 1  ;;  %v961_v58 = vor.u32 %v960_v50, %v956_v40  ;;  %v1131_v60 = vshrl.u32 %v1845_v52, 16  ;;  %v1133_v61 = vshll.u32 %v1845_v52, 16  ;;  %v2448_v21 = vld [vmem:[%s2338_s25 + $0x24] sm:$0x1f]   ;;  %v2244_v22 = vld [vmem:[%s2338_s25 + $0x34] sm:$0xff]  }
  0x1c   : > { %1991 = vmatprep.mubr.msk.bf16.mxu0 %vm2275_vm1, %v2274_v1  ;;  %2005 = vmatprep.mubr.msk.bf16.mxu1 %vm2275_vm1, %v2274_v1  ;;  %v969_v59 = vor.u32 %v967_v43, %v965_v51  ;;  %v1140_v62 = vrot.slane %v1138_v55, 1  ;;  %v979_v0 = vshll.u32 %v2239_v56, 16  ;;  %v1142_v3 = vshrl.u32 %v2409_v48, 16  ;;  %v2220_v29 = vld [vmem:[%s2338_s25 + $0x18] sm:$0xff]   ;;  %v2246_v43 = vld [vmem:[%s2338_s25 + $0x44] sm:$0xff]  }
  0x1d   : > { %v977_v63 = vor.u32 %v975_v57, %v973_v54  ;;  %v2424_v4 = vsel %vm511_vm3, %v961_v58, %v965_v51  ;;  %v1135_v6 = vrot.slane %v1133_v61, 1  ;;  %v983_v8 = vshrl.u32 %v2239_v56, 16  ;;  %v2248_v51 = vld [vmem:[%s2338_s25 + $0x4c] sm:$0xff]   ;;  %v2491_v58 = vld [vmem:[%s2338_s25 + $0x54] sm:$0x1f]  }
  0x1e   : > { %v2427_v5 = vsel %vm511_vm3, %v969_v59, %v973_v54  ;;  %v534_v9 = vor.u32 %v532_v32, %v530_v33  ;;  %v981_v10 = vrot.slane %v979_v0, 1  ;;  %v1144_v11 = vor.u32 %v1142_v3, %v1140_v62  ;;  %v2222_v61 = vld [vmem:[%s2338_s25 + $0x20] ss:$0 sps:$4 sm:$0xff]  }
  0x1f   : > { %v1146_v12 = vshll.u32 %v2419_v2, 16  ;;  %v544_v13 = vshll.u32 %v2412_v49, 16  ;;  %v987_v15 = vshll.u32 %v2430_v7, 16  ;;  %v1150_v17 = vshrl.u32 %v2419_v2, 16 }
  0x20   : > { %v2445_v18 = vsel %vm511_vm3, %v977_v63, %v981_v10  ;;  %v539_v30 = vsel %vm511_vm3, %v534_v9, %v2395_v38  ;;  %v1162_v33 = vshll.u32 %v2448_v21, 16  ;;  %v1306_v37 = vshrl.u32 %v2244_v22, 16 }
  0x21   : > { %v1148_v19 = vrot.slane %v1146_v12, 1  ;;  %v2454_v25 = vrot.slane %v987_v15, 1  ;;  %v542_v39 = vor.u32 %v540_v34, %v2395_v38  ;;  %v1308_v41 = vshll.u32 %v2244_v22, 16 }
  0x22   : > { %v2473_v40 = vrot.slane %v1162_v33, 1  ;;  %v546_v44 = vrot.slane %v544_v13, 1  ;;  %v1321_v38 = vshll.u32 %v2246_v43, 16  ;;  %v1329_v57 = vshll.u32 %v2248_v51, 16  ;;  %v2233_v33 = vld [vmem:[%s2338_s25 + $0xb0] ss:$0 sps:$4 sm:$0xff]  }
  0x23   : > { %1992 = vmatmul.mubr.msk.bf16.gmra.mrb[8].mxu0 %vm269_vm2, %v2213_v14  ;;  %2006 = vmatmul.mubr.msk.bf16.vlgmr.msra.gmra.mrb[8].mxu1 %vm269_vm2, %v2214_v16  ;;  %v1136_v14 = vor.u32 %v1135_v6, %v1131_v60  ;;  %v2441_v16 = vld [vmem:[%s2338_s25 + $0x1c] sm:$0xff]   ;;  %v1152_v32 = vor.u32 %v1150_v17, %v1148_v19  ;;  %v1310_v24 = vrot.slane %v1308_v41, 1  ;;  %v1333_v60 = vshrl.u32 %v2248_v51, 16  ;;  %v1844_v17 = vld [vmem:[%s2704_s1 + $0xc] sm:$0x3] }
  0x24   : > { %2027 = vmatprep.mubr.msk.bf16.mxu0 %vm2275_vm1, %v2274_v1  ;;  %2048 = vmatpush3.bf16.msra.mxu1 %v701_v20  ;;  %v985_v20 = vor.u32 %v983_v8, %v981_v10  ;;  %v1158_v27 = vshrl.u32 %v2441_v16, 16  ;;  %v1323_v56 = vrot.slane %v1321_v38, 1  ;;  %v547_v59 = vsel %vm511_vm3, %v542_v39, %v546_v44  ;;  %v1876_v39 = vld [vmem:[%s2704_s1 + $0x10] sm:$0x3] }
  0x25   : > { %2009 = vmatprep.mubr.msk.bf16.mxu1 %vm2275_vm1, %v2274_v1  ;;  %2091 = vmatprep.subr.bf16.mxu1 %v2274_v1  ;;  %v2452_v23 = vsel %vm511_vm3, %v1136_v14, %v1140_v62  ;;  %v1311_v54 = vor.u32 %v1310_v24, %v1306_v37  ;;  %v1331_v3 = vrot.slane %v1329_v57, 1  ;;  %v1337_v6 = vshll.u32 %v2491_v58, 16  ;;  %v2224_v14 = vld [vmem:[%s2338_s25 + $0x60] sm:$0xff]  }
  0x26   : > { %v2468_v35 = vsel %vm511_vm3, %v985_v20, %v2454_v25  ;;  %v548_v10 = vshrl.u32 %v2412_v49, 16  ;;  %v1833_v49 = vld [vmem:[%s2704_s1 + $0xa] sm:$0x3]  ;;  %v1185_v22 = vsel %vm285_vm0, %v1844_v17, 0  ;;  %v1475_v41 = vsel %vm285_vm0, %v1876_v39, 0 }
  0x27   : > { %v1335_v9 = vor.u32 %v1333_v60, %v1331_v3  ;;  %v1010_v15 = vsel %vm285_vm0, %v1833_v49, 0  ;;  %v2225_v20 = vld [vmem:[%s2338_s25 + $0x68] sm:$0xff]  }
  0x28   : > { %v550_v13 = vor.u32 %v548_v10, %v546_v44  ;;  %v1457_v44 = vrot.slane %v2448_v21, 1 }
  0x2b   : > { %2028 = vmatmul.mubr.msk.bf16.vlgmr.msra.gmra.mrb[12].mxu0 %vm269_vm2, %v523_v28  ;;  %2010 = vmatmul.mubr.msk.bf16.gmra.mrb[12].mxu1 %vm269_vm2, %v2215_v26  ;;  %v1154_v26 = vshll.u32 %v2441_v16, 16  ;;  %v2245_v28 = vld [vmem:[%s2338_s25 + $0x3c] sm:$0xff]  }
  0x2c   : > { %2070 = vmatpush3.bf16.msra.mxu0 %v835_v31  ;;  %2013 = vmatprep.mubr.msk.bf16.mxu1 %vm2275_vm1, %v2274_v1  ;;  %v2463_v31 = vsel %vm511_vm3, %v1144_v11, %v1148_v19  ;;  %v1313_v42 = vshll.u32 %v2245_v28, 16  ;;  %v1317_v50 = vshrl.u32 %v2245_v28, 16  ;;  %v2507_v11 = vrot.slane %v1337_v6, 1  ;;  %v2226_v19 = vld [vmem:[%s2338_s25 + $0x90] sm:$0xff]   ;;  %v2230_v28 = vld [vmem:[%s2338_s25 + $0xa0] sm:$0xff]  }
  0x2d   : > { %2031 = vmatprep.mubr.msk.bf16.mxu0 %vm2275_vm1, %v2274_v1  ;;  %2113 = vmatprep.subr.bf16.mxu0 %v2274_v1  ;;  %v1156_v36 = vrot.slane %v1154_v26, 1  ;;  %v2228_v26 = vld [vmem:[%s2338_s25 + $0x98] sm:$0xff]  }
  0x2e   : > { %v1315_v34 = vrot.slane %v1313_v42, 1  ;;  %v2516_v12 = vsel %vm511_vm3, %v1335_v9, %v2507_v11 }
  0x2f   : > { %v1160_v46 = vor.u32 %v1158_v27, %v1156_v36  ;;  %v2227_v27 = vld [vmem:[%s2338_s25 + $0x70] sm:$0xff]  }
  0x30   : > { %v1319_v55 = vor.u32 %v1317_v50, %v1315_v34  ;;  %v2496_v62 = vsel %vm511_vm3, %v1311_v54, %v1315_v34 }
  0x31   : > { %v2488_v52 = vsel %vm511_vm3, %v1160_v46, %v2473_v40 }
  0x32   : > { %v2499_v63 = vsel %vm511_vm3, %v1319_v55, %v1323_v56 }
  0x33   : > { %2032 = vmatmul.mubr.msk.bf16.gmra.mrb[16].mxu0 %vm269_vm2, %v531_v53  ;;  %2014 = vmatmul.mubr.msk.bf16.gmra.mrb[16].mxu1 %vm269_vm2, %v2218_v45  ;;  %v2478_v45 = vsel %vm511_vm3, %v1152_v32, %v1156_v36  ;;  %v1325_v53 = vshrl.u32 %v2246_v43, 16  ;;  %v2231_v32 = vld [vmem:[%s2338_s25 + $0x80] ss:$0 sps:$4 sm:$0xff]   ;;  %v1865_v36 = vld [vmem:[%s2704_s1 + $0xe] sm:$0x3]  ;;  %v1341_v43 = vshrl.u32 %v2491_v58, 16 }
  0x34   : > { %2035 = vmatprep.mubr.msk.bf16.mxu0 %vm2275_vm1, %v2274_v1  ;;  %2017 = vmatprep.mubr.msk.bf16.mxu1 %vm2275_vm1, %v2274_v1  ;;  %v1360_v37 = vsel %vm285_vm0, %v1865_v36, 0 }
  0x35   : > { %v1327_v0 = vor.u32 %v1325_v53, %v1323_v56 }
  0x37   : > { %v2503_v8 = vsel %vm511_vm3, %v1327_v0, %v1331_v3 }
  0x3b   : > { %2036 = vmatmul.mubr.msk.bf16.gmra.mrb[20].mxu0 %vm269_vm2, %v539_v30  ;;  %2018 = vmatmul.mubr.msk.bf16.gmra.mrb[20].mxu1 %vm269_vm2, %v2220_v29  ;;  %v2229_v29 = vld [vmem:[%s2338_s25 + $0x78] sm:$0xff]   ;;  %v2232_v30 = vld [vmem:[%s2338_s25 + $0xa8] sm:$0xff]  }
  0x3c   : > { %2039 = vmatprep.mubr.msk.bf16.mxu0 %vm2275_vm1, %v2274_v1  ;;  %2021 = vmatprep.mubr.msk.bf16.mxu1 %vm2275_vm1, %v2274_v1 }
  0x43   : > { %2040 = vmatmul.mubr.msk.bf16.gmra.mrb[24].mxu0 %vm269_vm2, %v547_v59  ;;  %2022 = vmatmul.mubr.msk.bf16.gmra.mrb[24].mxu1 %vm269_vm2, %v2222_v61 }
  0x44   : > { %2043 = vmatprep.mubr.msk.bf16.mxu0 %vm2275_vm1, %v2274_v1  ;;  %2049 = vmatprep.mubr.msk.bf16.mxu1 %vm2275_vm1, %v2274_v1 }
  0x4b   : > { %2044 = vmatmul.mubr.msk.bf16.gmra.mrb[28].mxu0 %vm269_vm2, %v550_v13  ;;  %2050 = vmatmul.mubr.msk.bf16.vlgmr.msra.gmra.mrb[28].mxu1 %vm269_vm2, %v2224_v14 }
  0x4c   : > { %2071 = vmatprep.mubr.msk.bf16.mxu0 %vm2275_vm1, %v2274_v1  ;;  %2092 = vmatpush3.bf16.msra.mxu1 %v1010_v15 }
  0x4d   : > { %2053 = vmatprep.mubr.msk.bf16.mxu1 %vm2275_vm1, %v2274_v1  ;;  %2135 = vmatprep.subr.bf16.mxu1 %v2274_v1 }
  0x53   : > { %2072 = vmatmul.mubr.msk.bf16.vlgmr.msra.gmra.mrb[32].mxu0 %vm269_vm2, %v2226_v19  ;;  %2054 = vmatmul.mubr.msk.bf16.gmra.mrb[32].mxu1 %vm269_vm2, %v2225_v20 }
  0x54   : > { %2114 = vmatpush3.bf16.msra.mxu0 %v1185_v22  ;;  %2057 = vmatprep.mubr.msk.bf16.mxu1 %vm2275_vm1, %v2274_v1 }
  0x55   : > { %2075 = vmatprep.mubr.msk.bf16.mxu0 %vm2275_vm1, %v2274_v1  ;;  %2157 = vmatprep.subr.bf16.mxu0 %v2274_v1 }
  0x5b   : > { %2076 = vmatmul.mubr.msk.bf16.gmra.mrb[36].mxu0 %vm269_vm2, %v2228_v26  ;;  %2058 = vmatmul.mubr.msk.bf16.gmra.mrb[36].mxu1 %vm269_vm2, %v2227_v27 }
  0x5c   : > { %2079 = vmatprep.mubr.msk.bf16.mxu0 %vm2275_vm1, %v2274_v1  ;;  %2061 = vmatprep.mubr.msk.bf16.mxu1 %vm2275_vm1, %v2274_v1 }
  0x63   : > { %2080 = vmatmul.mubr.msk.bf16.gmra.mrb[40].mxu0 %vm269_vm2, %v2230_v28  ;;  %2062 = vmatmul.mubr.msk.bf16.gmra.mrb[40].mxu1 %vm269_vm2, %v2229_v29 }
  0x64   : > { %2083 = vmatprep.mubr.msk.bf16.mxu0 %vm2275_vm1, %v2274_v1  ;;  %2065 = vmatprep.mubr.msk.bf16.mxu1 %vm2275_vm1, %v2274_v1 }
  0x6b   : > { %2084 = vmatmul.mubr.msk.bf16.gmra.mrb[44].mxu0 %vm269_vm2, %v2232_v30  ;;  %2066 = vmatmul.mubr.msk.bf16.gmra.mrb[44].mxu1 %vm269_vm2, %v2231_v32 }
  0x6c   : > { %2087 = vmatprep.mubr.msk.bf16.mxu0 %vm2275_vm1, %v2274_v1  ;;  %2093 = vmatprep.mubr.msk.bf16.mxu1 %vm2275_vm1, %v2274_v1 }
  0x73   : > { %2088 = vmatmul.mubr.msk.bf16.gmra.mrb[48].mxu0 %vm269_vm2, %v2233_v33  ;;  %2094 = vmatmul.mubr.msk.bf16.vlgmr.msra.gmra.mrb[48].mxu1 %vm269_vm2, %v2424_v4  ;;  %v991_v4 = vshrl.u32 %v2430_v7, 16 }
  0x74   : > { %2115 = vmatprep.mubr.msk.bf16.mxu0 %vm2275_vm1, %v2274_v1  ;;  %2136 = vmatpush3.bf16.msra.mxu1 %v1360_v37 }
  0x75   : > { %2097 = vmatprep.mubr.msk.bf16.mxu1 %vm2275_vm1, %v2274_v1 }
  0x7b   : > { %2116 = vmatmul.mubr.msk.bf16.vlgmr.msra.gmra.mrb[52].mxu0 %vm269_vm2, %v2452_v23  ;;  %2098 = vmatmul.mubr.msk.bf16.gmra.mrb[52].mxu1 %vm269_vm2, %v2427_v5  ;;  %v993_v5 = vor.u32 %v991_v4, %v2454_v25  ;;  %v1443_v23 = vld [vmem:[%s2338_s25 + $0x4] sm:$0xe] }
  0x7c   : > { %2158 = vmatpush3.bf16.msra.mxu0 %v1475_v41  ;;  %2101 = vmatprep.mubr.msk.bf16.mxu1 %vm2275_vm1, %v2274_v1 }
  0x7d   : > { %2119 = vmatprep.mubr.msk.bf16.mxu0 %vm2275_vm1, %v2274_v1 }
  0x83   : > { %2120 = vmatmul.mubr.msk.bf16.gmra.mrb[56].mxu0 %vm269_vm2, %v2463_v31  ;;  %2102 = vmatmul.mubr.msk.bf16.gmra.mrb[56].mxu1 %vm269_vm2, %v2445_v18  ;;  %v1166_v18 = vshrl.u32 %v2448_v21, 16  ;;  %v1877_v31 = vcombine.low %v1443_v23, %v2406_v47  ;;  %v1453_v47 = vrot.slane %v2419_v2, 1 }
  0x84   : > { %2123 = vmatprep.mubr.msk.bf16.mxu0 %vm2275_vm1, %v2274_v1  ;;  %2105 = vmatprep.mubr.msk.bf16.mxu1 %vm2275_vm1, %v2274_v1 }
  0x85   : > { %v1168_v7 = vor.u32 %v1166_v18, %v2473_v40  ;;  %v1450_v25 = vrot.slane %v1877_v31, 1  ;;  %v1455_v40 = vrot.slane %v2441_v16, 1  ;;  %v1343_v16 = vor.u32 %v1341_v43, %v2507_v11 }
  0x87   : > { %v1456_v2 = vsel %vm1449_vm4, %v1453_v47, %v1455_v40 }
  0x8b   : > { %2124 = vmatmul.mubr.msk.bf16.gmra.mrb[60].mxu0 %vm269_vm2, %v2478_v45  ;;  %2106 = vmatmul.mubr.msk.bf16.gmra.mrb[60].mxu1 %vm269_vm2, %v2468_v35  ;;  %v1451_v35 = vrot.slane %v2409_v48, 1  ;;  %v1458_v45 = vsel %vm1449_vm4, %v1455_v40, %v1457_v44 }
  0x8c   : > { %2127 = vmatprep.mubr.msk.bf16.mxu0 %vm2275_vm1, %v2274_v1  ;;  %2109 = vmatprep.mubr.msk.bf16.mxu1 %vm2275_vm1, %v2274_v1 }
  0x8d   : > { %v1452_v42 = vsel %vm1449_vm4, %v1450_v25, %v1451_v35  ;;  %v1454_v48 = vsel %vm1449_vm4, %v1451_v35, %v1453_v47 }
  0x93   : > { %2128 = vmatmul.mubr.msk.bf16.gmra.mrb[64].mxu0 %vm269_vm2, %v2488_v52  ;;  %2110 = vmatmul.mubr.msk.bf16.gmra.mrb[64].mxu1 %vm269_vm2, %v993_v5 }
  0x94   : > { %2131 = vmatprep.mubr.msk.bf16.mxu0 %vm2275_vm1, %v2274_v1  ;;  %2137 = vmatprep.mubr.msk.bf16.mxu1 %vm2275_vm1, %v2274_v1 }
  0x9b   : > { %2132 = vmatmul.mubr.msk.bf16.gmra.mrb[68].mxu0 %vm269_vm2, %v1168_v7  ;;  %2138 = vmatmul.mubr.msk.bf16.vlgmr.msra.gmra.mrb[68].mxu1 %vm269_vm2, %v2496_v62 }
  0x9c   : > { %2159 = vmatprep.mubr.msk.bf16.mxu0 %vm2275_vm1, %v2274_v1  ;;  %2141 = vmatprep.mubr.msk.bf16.mxu1 %vm2275_vm1, %v2274_v1 }
  0xa3   : > { %2160 = vmatmul.mubr.msk.bf16.vlgmr.msra.gmra.mrb[72].mxu0 %vm269_vm2, %v1452_v42  ;;  %2142 = vmatmul.mubr.msk.bf16.gmra.mrb[72].mxu1 %vm269_vm2, %v2499_v63 }
  0xa4   : > { %2163 = vmatprep.mubr.msk.bf16.mxu0 %vm2275_vm1, %v2274_v1  ;;  %2145 = vmatprep.mubr.msk.bf16.mxu1 %vm2275_vm1, %v2274_v1 }
  0xab   : > { %2164 = vmatmul.mubr.msk.bf16.gmra.mrb[76].mxu0 %vm269_vm2, %v1454_v48  ;;  %2146 = vmatmul.mubr.msk.bf16.gmra.mrb[76].mxu1 %vm269_vm2, %v2503_v8 }
  0xac   : > { %2167 = vmatprep.mubr.msk.bf16.mxu0 %vm2275_vm1, %v2274_v1  ;;  %2149 = vmatprep.mubr.msk.bf16.mxu1 %vm2275_vm1, %v2274_v1 }
  0xb3   : > { %2168 = vmatmul.mubr.msk.bf16.gmra.mrb[80].mxu0 %vm269_vm2, %v1456_v2  ;;  %2150 = vmatmul.mubr.msk.bf16.gmra.mrb[80].mxu1 %vm269_vm2, %v2516_v12 }
  0xb4   : > { %2171 = vmatprep.mubr.msk.bf16.mxu0 %vm2275_vm1, %v2274_v1  ;;  %2153 = vmatprep.mubr.msk.bf16.mxu1 %vm2275_vm1, %v2274_v1 }
  0xbb   : > { %2172 = vmatmul.mubr.msk.bf16.gmra.mrb[84].mxu0 %vm269_vm2, %v1458_v45  ;;  %2154 = vmatmul.mubr.msk.bf16.gmra.mrb[84].mxu1 %vm269_vm2, %v1343_v16 }
  0xbc   : > { %2175 = vmatprep.mubr.msk.bf16.mxu0 %vm2275_vm1, %v2274_v1 }
  0xc3   : > { %2176 = vmatmul.mubr.msk.bf16.gmra.mrb[88].mxu0 %vm269_vm2, %v1457_v44 }
  0xe6   : > { %v323_v46 = vpop.f32.mrb[0].mxu0  ;;  %v347_v24 = vpop.f32.mrb[0].mxu1 }
  0xe7   : > { %v1985_v50 = vpop.f32.mrb[1].mxu0  ;;  %v1997_v34 = vpop.f32.mrb[1].mxu1 }
  0xe8   : > { %v326_v21 = vpop.f32.mrb[2].mxu0  ;;  %v350_v51 = vpop.f32.mrb[2].mxu1 }
  0xe9   : > { %v1986_v38 = vpop.f32.mrb[3].mxu0  ;;  %v1998_v52 = vpop.f32.mrb[3].mxu1 }
  0xee   : > { %v331_v53 = vpop.f32.mrb[4].mxu0  ;;  %v355_v55 = vpop.f32.mrb[4].mxu1 }
  0xef   : > { %v1989_v54 = vpop.f32.mrb[5].mxu0  ;;  %v2001_v57 = vpop.f32.mrb[5].mxu1 }
  0xf0   : > { %v334_v56 = vpop.f32.mrb[6].mxu0  ;;  %v358_v59 = vpop.f32.mrb[6].mxu1 }
  0xf1   : > { %v1990_v58 = vpop.f32.mrb[7].mxu0  ;;  %v2002_v60 = vpop.f32.mrb[7].mxu1 }
  0xf6   : > { %v339_v61 = vpop.f32.mrb[8].mxu0  ;;  %v436_v1 = vpop.f32.mrb[8].mxu1 }
  0xf7   : > { %v1993_v62 = vpop.f32.mrb[9].mxu0  ;;  %v437_v63 = vadd.f32 %v436_v1, %v323_v46  ;;  %v2007_v0 = vpop.f32.mrb[9].mxu1 }
  0xf8   : > { %v342_v3 = vpop.f32.mrb[10].mxu0  ;;  %v439_v6 = vpop.f32.mrb[10].mxu1 }
  0xf9   : > { %v1994_v8 = vpop.f32.mrb[11].mxu0  ;;  %v440_v9 = vadd.f32 %v439_v6, %v326_v21  ;;  %v2008_v10 = vpop.f32.mrb[11].mxu1 }
  0xfe   : > { %v603_v11 = vpop.f32.mrb[12].mxu0  ;;  %v444_v12 = vpop.f32.mrb[12].mxu1 }
  0xff   : > { %v641_v13 = vadd.f32 %v603_v11, %v437_v63  ;;  %v2029_v49 = vpop.f32.mrb[13].mxu0  ;;  %v445_v14 = vadd.f32 %v444_v12, %v331_v53  ;;  %v2011_v15 = vpop.f32.mrb[13].mxu1 }
 0x100   : > { %v606_v17 = vpop.f32.mrb[14].mxu0  ;;  %v447_v19 = vpop.f32.mrb[14].mxu1 }
 0x101   : > { %v642_v20 = vadd.f32 %v606_v17, %v440_v9  ;;  %v2030_v22 = vpop.f32.mrb[15].mxu0  ;;  %v448_v26 = vadd.f32 %v447_v19, %v334_v56  ;;  %v2012_v27 = vpop.f32.mrb[15].mxu1 }
 0x106   : > { %v611_v28 = vpop.f32.mrb[16].mxu0  ;;  %v452_v29 = vpop.f32.mrb[16].mxu1 }
 0x107   : > { %v643_v30 = vadd.f32 %v611_v28, %v445_v14  ;;  %v2033_v32 = vpop.f32.mrb[17].mxu0  ;;  %v453_v33 = vadd.f32 %v452_v29, %v339_v61  ;;  %v2015_v36 = vpop.f32.mrb[17].mxu1 }
 0x108   : > { %v614_v37 = vpop.f32.mrb[18].mxu0  ;;  %v455_v39 = vpop.f32.mrb[18].mxu1 }
 0x109   : > { %v644_v41 = vadd.f32 %v614_v37, %v448_v26  ;;  %v2034_v4 = vpop.f32.mrb[19].mxu0  ;;  %v456_v5 = vadd.f32 %v455_v39, %v342_v3  ;;  %v2016_v18 = vpop.f32.mrb[19].mxu1 }
 0x10e   : > { %v619_v23 = vpop.f32.mrb[20].mxu0  ;;  %v460_v7 = vpop.f32.mrb[20].mxu1 }
 0x10f   : > { %v645_v31 = vadd.f32 %v619_v23, %v453_v33  ;;  %v2037_v25 = vpop.f32.mrb[21].mxu0  ;;  %v461_v35 = vadd.f32 %v460_v7, %v347_v24  ;;  %v2019_v42 = vpop.f32.mrb[21].mxu1 }
 0x110   : > { %v622_v47 = vpop.f32.mrb[22].mxu0  ;;  %v463_v48 = vpop.f32.mrb[22].mxu1 }
 0x111   : > { %v646_v40 = vadd.f32 %v622_v47, %v456_v5  ;;  %v2038_v2 = vpop.f32.mrb[23].mxu0  ;;  %v464_v43 = vadd.f32 %v463_v48, %v350_v51  ;;  %v2020_v44 = vpop.f32.mrb[23].mxu1 }
 0x116   : > { %v627_v16 = vpop.f32.mrb[24].mxu0  ;;  %v468_v45 = vpop.f32.mrb[24].mxu1 }
 0x117   : > { %v647_v46 = vadd.f32 %v627_v16, %v461_v35  ;;  %v2041_v50 = vpop.f32.mrb[25].mxu0  ;;  %v469_v21 = vadd.f32 %v468_v45, %v355_v55  ;;  %v2023_v38 = vpop.f32.mrb[25].mxu1 }
 0x118   : > { %v630_v34 = vpop.f32.mrb[26].mxu0  ;;  %v471_v54 = vpop.f32.mrb[26].mxu1 }
 0x119   : > { %v648_v52 = vadd.f32 %v630_v34, %v464_v43  ;;  %v2042_v53 = vpop.f32.mrb[27].mxu0  ;;  %v2024_v56 = vpop.f32.mrb[27].mxu1 }
 0x11e   : > { %v635_v57 = vpop.f32.mrb[28].mxu0  ;;  %v737_v58 = vpop.f32.mrb[28].mxu1 }
 0x11f   : > { %v649_v24 = vadd.f32 %v635_v57, %v469_v21  ;;  %v2045_v59 = vpop.f32.mrb[29].mxu0  ;;  %v775_v60 = vadd.f32 %v737_v58, %v641_v13  ;;  %v2051_v61 = vpop.f32.mrb[29].mxu1 }
 0x120   : > { %v638_v1 = vpop.f32.mrb[30].mxu0  ;;  %v740_v51 = vpop.f32.mrb[30].mxu1 }
 0x121   : > { %v2046_v62 = vpop.f32.mrb[31].mxu0  ;;  %v776_v63 = vadd.f32 %v740_v51, %v642_v20  ;;  %v2052_v0 = vpop.f32.mrb[31].mxu1 }
 0x126   : > { %v871_v3 = vpop.f32.mrb[32].mxu0  ;;  %v745_v6 = vpop.f32.mrb[32].mxu1 }
 0x127   : > { %v909_v55 = vadd.f32 %v871_v3, %v775_v60  ;;  %v2073_v8 = vpop.f32.mrb[33].mxu0  ;;  %v777_v9 = vadd.f32 %v745_v6, %v643_v30  ;;  %v2055_v10 = vpop.f32.mrb[33].mxu1 }
 0x128   : > { %v874_v11 = vpop.f32.mrb[34].mxu0  ;;  %v748_v12 = vpop.f32.mrb[34].mxu1 }
 0x129   : > { %v910_v49 = vadd.f32 %v874_v11, %v776_v63  ;;  %v2074_v14 = vpop.f32.mrb[35].mxu0  ;;  %v778_v15 = vadd.f32 %v748_v12, %v644_v41  ;;  %v2056_v17 = vpop.f32.mrb[35].mxu1 }
 0x12e   : > { %v879_v19 = vpop.f32.mrb[36].mxu0  ;;  %v753_v13 = vpop.f32.mrb[36].mxu1 }
 0x12f   : > { %v911_v22 = vadd.f32 %v879_v19, %v777_v9  ;;  %v2077_v26 = vpop.f32.mrb[37].mxu0  ;;  %v779_v27 = vadd.f32 %v753_v13, %v645_v31  ;;  %v2059_v28 = vpop.f32.mrb[37].mxu1 }
 0x130   : > { %v882_v20 = vpop.f32.mrb[38].mxu0  ;;  %v756_v29 = vpop.f32.mrb[38].mxu1 }
 0x131   : > { %v912_v32 = vadd.f32 %v882_v20, %v778_v15  ;;  %v2078_v33 = vpop.f32.mrb[39].mxu0  ;;  %v780_v36 = vadd.f32 %v756_v29, %v646_v40  ;;  %v2060_v37 = vpop.f32.mrb[39].mxu1 }
 0x136   : > { %v887_v30 = vpop.f32.mrb[40].mxu0  ;;  %v761_v39 = vpop.f32.mrb[40].mxu1 }
 0x137   : > { %v913_v4 = vadd.f32 %v887_v30, %v779_v27  ;;  %v2081_v5 = vpop.f32.mrb[41].mxu0  ;;  %v781_v18 = vadd.f32 %v761_v39, %v647_v46  ;;  %v2063_v23 = vpop.f32.mrb[41].mxu1 }
 0x138   : > { %v890_v41 = vpop.f32.mrb[42].mxu0  ;;  %v764_v7 = vpop.f32.mrb[42].mxu1 }
 0x139   : > { %v914_v25 = vadd.f32 %v890_v41, %v780_v36  ;;  %v2082_v35 = vpop.f32.mrb[43].mxu0  ;;  %v782_v42 = vadd.f32 %v764_v7, %v648_v52  ;;  %v2064_v47 = vpop.f32.mrb[43].mxu1 }
 0x13e   : > { %v895_v31 = vpop.f32.mrb[44].mxu0  ;;  %v769_v48 = vpop.f32.mrb[44].mxu1 }
 0x13f   : > { %v915_v2 = vadd.f32 %v895_v31, %v781_v18  ;;  %v2085_v43 = vpop.f32.mrb[45].mxu0  ;;  %v783_v44 = vadd.f32 %v769_v48, %v649_v24  ;;  %v2067_v40 = vpop.f32.mrb[45].mxu1 }
 0x140   : > { %v898_v16 = vpop.f32.mrb[46].mxu0  ;;  %v772_v21 = vpop.f32.mrb[46].mxu1 }
 0x141   : > { %v916_v45 = vadd.f32 %v898_v16, %v782_v42  ;;  %v2086_v50 = vpop.f32.mrb[47].mxu0  ;;  %v2068_v34 = vpop.f32.mrb[47].mxu1 }
 0x146   : > { %v903_v38 = vpop.f32.mrb[48].mxu0  ;;  %v1046_v53 = vpop.f32.mrb[48].mxu1 }
 0x147   : > { %v917_v46 = vadd.f32 %v903_v38, %v783_v44  ;;  %v2089_v54 = vpop.f32.mrb[49].mxu0  ;;  %v1084_v56 = vadd.f32 %v1046_v53, %v909_v55  ;;  %v2095_v57 = vpop.f32.mrb[49].mxu1 }
 0x148   : > { %v906_v58 = vpop.f32.mrb[50].mxu0  ;;  %v1049_v52 = vpop.f32.mrb[50].mxu1  ;;  %v2670_v57 = vld [vmem:[%s2705_s2] ss:$0 sm:$0xff] }
 0x149   : > { %v2090_v59 = vpop.f32.mrb[51].mxu0  ;;  %v1085_v60 = vadd.f32 %v1049_v52, %v910_v49  ;;  %v2096_v61 = vpop.f32.mrb[51].mxu1 }
 0x14e   : > { %v1221_v1 = vpop.f32.mrb[52].mxu0  ;;  %v1054_v51 = vpop.f32.mrb[52].mxu1 }
 0x14f   : > { %v1259_v24 = vadd.f32 %v1221_v1, %v1084_v56  ;;  %v2117_v62 = vpop.f32.mrb[53].mxu0  ;;  %v1086_v63 = vadd.f32 %v1054_v51, %v911_v22  ;;  %v2099_v0 = vpop.f32.mrb[53].mxu1 }
 0x150   : > { %v1224_v3 = vpop.f32.mrb[54].mxu0  ;;  %v1057_v6 = vpop.f32.mrb[54].mxu1 }
 0x151   : > { %v1260_v8 = vadd.f32 %v1224_v3, %v1085_v60  ;;  %v2118_v9 = vpop.f32.mrb[55].mxu0  ;;  %v1087_v10 = vadd.f32 %v1057_v6, %v912_v32  ;;  %v2100_v11 = vpop.f32.mrb[55].mxu1 }
 0x156   : > { %v1229_v12 = vpop.f32.mrb[56].mxu0  ;;  %v1062_v55 = vpop.f32.mrb[56].mxu1 }
 0x157   : > { %v1261_v14 = vadd.f32 %v1229_v12, %v1086_v63  ;;  %v2121_v15 = vpop.f32.mrb[57].mxu0  ;;  %v1088_v17 = vadd.f32 %v1062_v55, %v913_v4  ;;  %v2103_v19 = vpop.f32.mrb[57].mxu1 }
 0x158   : > { %v1232_v49 = vpop.f32.mrb[58].mxu0  ;;  %v1065_v13 = vpop.f32.mrb[58].mxu1 }
 0x159   : > { %v1262_v26 = vadd.f32 %v1232_v49, %v1087_v10  ;;  %v2122_v27 = vpop.f32.mrb[59].mxu0  ;;  %v1089_v28 = vadd.f32 %v1065_v13, %v914_v25  ;;  %v2104_v20 = vpop.f32.mrb[59].mxu1 }
 0x15e   : > { %v1237_v22 = vpop.f32.mrb[60].mxu0  ;;  %v1070_v29 = vpop.f32.mrb[60].mxu1 }
 0x15f   : > { %v1263_v33 = vadd.f32 %v1237_v22, %v1088_v17  ;;  %v2125_v36 = vpop.f32.mrb[61].mxu0  ;;  %v1090_v37 = vadd.f32 %v1070_v29, %v915_v2  ;;  %v2107_v30 = vpop.f32.mrb[61].mxu1 }
 0x160   : > { %v1240_v32 = vpop.f32.mrb[62].mxu0  ;;  %v1073_v39 = vpop.f32.mrb[62].mxu1 }
 0x161   : > { %v1264_v5 = vadd.f32 %v1240_v32, %v1089_v28  ;;  %v2126_v18 = vpop.f32.mrb[63].mxu0  ;;  %v1091_v23 = vadd.f32 %v1073_v39, %v916_v45  ;;  %v2108_v41 = vpop.f32.mrb[63].mxu1 }
 0x166   : > { %v1245_v4 = vpop.f32.mrb[64].mxu0  ;;  %v1078_v7 = vpop.f32.mrb[64].mxu1 }
 0x167   : > { %v1265_v35 = vadd.f32 %v1245_v4, %v1090_v37  ;;  %v2129_v42 = vpop.f32.mrb[65].mxu0  ;;  %v1092_v47 = vadd.f32 %v1078_v7, %v917_v46  ;;  %v2111_v25 = vpop.f32.mrb[65].mxu1 }
 0x168   : > { %v1248_v31 = vpop.f32.mrb[66].mxu0  ;;  %v1081_v44 = vpop.f32.mrb[66].mxu1 }
 0x169   : > { %v2663_v48 = vadd.f32 %v1248_v31, %v1091_v23  ;;  %v2130_v43 = vpop.f32.mrb[67].mxu0  ;;  %v2112_v16 = vpop.f32.mrb[67].mxu1 }
 0x16e   : > { %v1253_v2 = vpop.f32.mrb[68].mxu0  ;;  %v1396_v50 = vpop.f32.mrb[68].mxu1 }
 0x16f   : > { %v2665_v40 = vadd.f32 %v1253_v2, %v1092_v47  ;;  %v2133_v21 = vpop.f32.mrb[69].mxu0  ;;  %v1434_v34 = vadd.f32 %v1396_v50, %v1259_v24  ;;  %v2139_v45 = vpop.f32.mrb[69].mxu1 }
 0x170   : > { %v1256_v38 = vpop.f32.mrb[70].mxu0  ;;  %v1399_v53 = vpop.f32.mrb[70].mxu1 }
 0x171   : > { %v2134_v54 = vpop.f32.mrb[71].mxu0  ;;  %v1435_v56 = vadd.f32 %v1399_v53, %v1260_v8  ;;  %v2140_v46 = vpop.f32.mrb[71].mxu1 }
 0x176   : > { %v1511_v58 = vpop.f32.mrb[72].mxu0  ;;  %v1404_v52 = vpop.f32.mrb[72].mxu1 }
 0x177   : > { %v1549_v59 = vadd.f32 %v1511_v58, %v1434_v34  ;;  %v2161_v60 = vpop.f32.mrb[73].mxu0  ;;  %v1436_v61 = vadd.f32 %v1404_v52, %v1261_v14  ;;  %v2143_v1 = vpop.f32.mrb[73].mxu1 }
 0x178   : > { %v1514_v51 = vpop.f32.mrb[74].mxu0  ;;  %v1407_v62 = vpop.f32.mrb[74].mxu1 }
 0x179   : > { %v1564_v24 = vadd.f32 %v2670_v57, %v1549_v59  ;;  %v1550_v63 = vadd.f32 %v1514_v51, %v1435_v56  ;;  %v2162_v0 = vpop.f32.mrb[75].mxu0  ;;  %v1437_v3 = vadd.f32 %v1407_v62, %v1262_v26  ;;  %v2144_v6 = vpop.f32.mrb[75].mxu1 }
 0x17b   : > { %v1565_v8 = vadd.f32 %v2670_v57, %v1550_v63  ;;  %v1573_v9 = vmax.f32 %v1564_v24, 0.0 }
 0x17d   : > { %v1574_v10 = vmax.f32 %v1565_v8, 0.0 }
 0x17e   : > { %v1519_v11 = vpop.f32.mrb[76].mxu0  ;;  %v1412_v55 = vpop.f32.mrb[76].mxu1 }
 0x17f   : > { %v1907_v12 = vpack.c.bf16 %v1574_v10, %v1573_v9  ;;  %v1551_v14 = vadd.f32 %v1519_v11, %v1436_v61  ;;  %v2165_v15 = vpop.f32.mrb[77].mxu0  ;;  %v1438_v17 = vadd.f32 %v1412_v55, %v1263_v33  ;;  %v2147_v19 = vpop.f32.mrb[77].mxu1 }
 0x180   : > { %v1522_v49 = vpop.f32.mrb[78].mxu0  ;;  %v1415_v26 = vpop.f32.mrb[78].mxu1 }
 0x181   : > { %1908 = vst [vmem:[%s2678_s20] sm:$0xff] %v1907_v12   ;;  %v1566_v13 = vadd.f32 %v2670_v57, %v1551_v14  ;;  %v1552_v27 = vadd.f32 %v1522_v49, %v1437_v3  ;;  %v2166_v28 = vpop.f32.mrb[79].mxu0  ;;  %v1439_v20 = vadd.f32 %v1415_v26, %v1264_v5  ;;  %v2148_v22 = vpop.f32.mrb[79].mxu1 }
 0x183   : > { %v1567_v29 = vadd.f32 %v2670_v57, %v1552_v27  ;;  %v1575_v36 = vmax.f32 %v1566_v13, 0.0 }
 0x185   : > { %v1576_v37 = vmax.f32 %v1567_v29, 0.0 }
 0x186   : > { %v1527_v30 = vpop.f32.mrb[80].mxu0  ;;  %v1420_v39 = vpop.f32.mrb[80].mxu1 }
 0x187   : > { %v1912_v32 = vpack.c.bf16 %v1576_v37, %v1575_v36  ;;  %v1553_v18 = vadd.f32 %v1527_v30, %v1438_v17  ;;  %v2169_v33 = vpop.f32.mrb[81].mxu0  ;;  %v1440_v23 = vadd.f32 %v1420_v39, %v1265_v35  ;;  %v2151_v41 = vpop.f32.mrb[81].mxu1 }
 0x188   : > { %v1530_v4 = vpop.f32.mrb[82].mxu0  ;;  %v1423_v42 = vpop.f32.mrb[82].mxu1 }
 0x189   : > { %1924 = vst [vmem:[%s2678_s20 + $0x8] sm:$0xff] %v1912_v32   ;;  %v1568_v7 = vadd.f32 %v2670_v57, %v1553_v18  ;;  %v1554_v47 = vadd.f32 %v1530_v4, %v1439_v20  ;;  %v2170_v5 = vpop.f32.mrb[83].mxu0  ;;  %v1441_v31 = vadd.f32 %v1423_v42, %v2663_v48  ;;  %v2152_v25 = vpop.f32.mrb[83].mxu1 }
 0x18b   : > { %v1569_v43 = vadd.f32 %v2670_v57, %v1554_v47  ;;  %v1577_v44 = vmax.f32 %v1568_v7, 0.0 }
 0x18d   : > { %v1578_v16 = vmax.f32 %v1569_v43, 0.0 }
 0x18e   : > { %v1535_v2 = vpop.f32.mrb[84].mxu0  ;;  %v1428_v21 = vpop.f32.mrb[84].mxu1 }
 0x18f   : > { %v1917_v50 = vpack.c.bf16 %v1578_v16, %v1577_v44  ;;  %v1555_v35 = vadd.f32 %v1535_v2, %v1440_v23  ;;  %v2173_v34 = vpop.f32.mrb[85].mxu0  ;;  %v1442_v45 = vadd.f32 %v1428_v21, %v2665_v40  ;;  %v2155_v53 = vpop.f32.mrb[85].mxu1 }
 0x190   : > { %v1538_v38 = vpop.f32.mrb[86].mxu0  ;;  %v1431_v46 = vpop.f32.mrb[86].mxu1 }
 0x191   : > { %1925 = vst [vmem:[%s2678_s20 + $0x10] sm:$0xff] %v1917_v50   ;;  %v1570_v54 = vadd.f32 %v2670_v57, %v1555_v35  ;;  %v1556_v56 = vadd.f32 %v1538_v38, %v1441_v31  ;;  %v2174_v48 = vpop.f32.mrb[87].mxu0  ;;  %v2156_v58 = vpop.f32.mrb[87].mxu1 }
 0x193   : > { %v1571_v52 = vadd.f32 %v2670_v57, %v1556_v56  ;;  %v1579_v59 = vmax.f32 %v1570_v54, 0.0 }
 0x195   : > { %v1580_v60 = vmax.f32 %v1571_v52, 0.0 }
 0x196   : > { %v1543_v61 = vpop.f32.mrb[88].mxu0 }
 0x197   : > { %v1922_v1 = vpack.c.bf16 %v1580_v60, %v1579_v59  ;;  %v1557_v51 = vadd.f32 %v1543_v61, %v1442_v45  ;;  %v2177_v24 = vpop.f32.mrb[89].mxu0 }
 0x198   : > { %v1546_v40 = vpop.f32.mrb[90].mxu0 }
 0x199   : > { %1926 = vst [vmem:[%s2678_s20 + $0x18] sm:$0xff] %v1922_v1   ;;  %v1572_v62 = vadd.f32 %v2670_v57, %v1557_v51  ;;  %v2178_v63 = vpop.f32.mrb[91].mxu0 }
 0x19b   : > { %v1581_v0 = vmax.f32 %v1572_v62, 0.0 }
 0x19d   : > { %v1903_v3 = vpack.c.bf16 %v1581_v0, %v1581_v0 }
 0x19f   : > { %1627 = vst [vmem:[%s2678_s20 + $0x20] sm:$0xf] %v1903_v3 }
 0x1a0 PF: > { %s13_s14 = sadd.s32 1, %s2272_s14   ;;  %s2707_s12 = smov %s2268_s13 }
 0x1a1   : > { %p10_p5 = scmp.ge.s32.totalorder %s13_s14, 4   ;;  %s2708_s13 = smov %s2710_s15 }
 0x1a3   :  { %12 = sbr.rel (!%p10_p5) target bundleno = 2 (0x2), region = 79 }

// kernel: block_iso_flop_doping_forward.3
= control target key start
LH: loop header
LB: loop body
LE: loop exit
PB: predicated region body
PF: predicated region fallthrough
CT: control target
= control target key end

     0   :  { %s3392_s21 = smov 0   ;;  %s3394_s22 = smov 0   ;;  %s4064_s0 = inlined_call_operand.vmem [shape: bf16[2,1,110,128], index: 0, kind: input, shape index: {}]   ;;  %s4065_s1 = inlined_call_operand.vmem [shape: bf16[9,128,128], index: 1, kind: input, shape index: {}]   ;;  %s4066_s2 = inlined_call_operand.vmem [shape: f32[1,128], index: 2, kind: input, shape index: {}]   ;;  %s4067_s3 = inlined_call_operand.vmem [shape: bf16[2,80,4], index: 3, kind: input, shape index: {}]   ;;  %s4068_s4 = inlined_call_operand.vmem [shape: bf16[4,128], index: 4, kind: input, shape index: {}]   ;;  %s4069_s5 = inlined_call_operand.vmem [shape: f32[1,128], index: 5, kind: input, shape index: {}]   ;;  %s4070_s6 = inlined_call_operand.vmem [shape: bf16[2,80,128], index: 6, kind: output, shape index: {}]  }
   0x1   :  { %s3396_s23 = smov 0  }
   0x2 LB: > { %s28_s24 = sadd.s32 1, %s3349_s22  ;;  %p2444_p0 = scmp.ge.s32.totalorder %s3353_s23, 1  ;;  %s3353_s23 = sphi %s3396_s23, %s16_s23   ;;  %s3349_s22 = sphi %s3394_s22, %s4072_s22   ;;  %s3345_s21 = sphi %s3392_s21, %s4071_s21  }
   0x3   : > { %p30_p1 = scmp.ge.s32.totalorder %s28_s24, 2  ;;  %p270_p2 = scmp.lt.s32.totalorder %s3353_s23, 3 }
   0x5   : > { %s4074_s24 = smov (%p30_p1, %s28_s24), 0  ;;  %p271_p3 = pnand %p2444_p0, %p270_p2 }
   0x6   : > { %v3231_v0 = vld [vmem:[%s4065_s1 + $0x40] sm:$0xff] (!%p271_p3)   ;;  %v3355_v1 = vmov (!%p271_p3), 0.0   ;;  %v3233_v3 = vld [vmem:[%s4065_s1 + $0x48] sm:$0xff] (!%p271_p3)   ;;  %vm3356_vm0 = vmmov (!%p271_p3), 0   ;;  %p322_p4 = scmp.lt.s32.totalorder (!%p271_p3), %s3345_s21, 1  ;;  %v3235_v5 = vld [vmem:[%s4065_s1 + $0x50] sm:$0xff] (!%p271_p3)  }
   0x7   : > { %274 = sbr.rel (%p271_p3) target bundleno = 458 (0x1ca), region = 44  ;;  %2857 = vmatprep.subr.bf16.mxu0 (!%p271_p3), %v3355_v1  ;;  %2893 = vmatprep.subr.bf16.mxu1 (!%p271_p3), %v3355_v1  ;;  %v3232_v2 = vld [vmem:[%s4065_s1] sm:$0xff] (!%p271_p3)   ;;  %v3234_v4 = vld [vmem:[%s4065_s1 + $0x8] sm:$0xff] (!%p271_p3)   ;;  %v3236_v6 = vld [vmem:[%s4065_s1 + $0x10] sm:$0xff] (!%p271_p3)   ;;  %vm428_vm1 = vsmask.f32 (!%p271_p3), 7424 }
   0x8   : > { %2858 = vmatpush3.bf16.msra.mxu0 (!%p271_p3), %v3231_v0  ;;  %2873 = vmatprep.mubr.msk.bf16.mxu0 (!%p271_p3), %vm3356_vm0, %v3355_v1  ;;  %v3237_v7 = vld [vmem:[%s4065_s1 + $0x58] sm:$0xff] (!%p271_p3)   ;;  %v3239_v9 = vld [vmem:[%s4065_s1 + $0x60] sm:$0xff] (!%p271_p3)   ;;  %v3241_v13 = vld [vmem:[%s4065_s1 + $0x68] sm:$0xff] (!%p271_p3)   ;;  %vm746_vm2 = vcmask (!%p271_p3), 1046528   ;;  %vm1118_vm3 = vsmask.f32 (!%p271_p3), 6400 }
   0x9   : > { %2894 = vmatpush3.bf16.msra.mxu1 (!%p271_p3), %v3232_v2  ;;  %2859 = vmatprep.subr.bf16.mxu0 (!%p271_p3), %v3355_v1  ;;  %v3238_v8 = vld [vmem:[%s4065_s1 + $0x18] sm:$0xff] (!%p271_p3)   ;;  %v3240_v10 = vld [vmem:[%s4065_s1 + $0x20] sm:$0xff] (!%p271_p3)   ;;  %v3242_v16 = vld [vmem:[%s4065_s1 + $0x28] sm:$0xff] (!%p271_p3)   ;;  %vm1329_vm4 = vcmask (!%p271_p3), 1045504   ;;  %vm1701_vm5 = vsmask.f32 (!%p271_p3), 5376 }
   0xa   : > { %2895 = vmatprep.subr.bf16.mxu1 (!%p271_p3), %v3355_v1  ;;  %2909 = vmatprep.mubr.msk.bf16.mxu1 (!%p271_p3), %vm3356_vm0, %v3355_v1  ;;  %v3243_v18 = vld [vmem:[%s4065_s1 + $0x70] sm:$0xff] (!%p271_p3)   ;;  %v3245_v23 = vld [vmem:[%s4065_s1 + $0x78] sm:$0xff] (!%p271_p3)   ;;  %v3249_v28 = vld [vmem:[%s4065_s1 + $0x80] sm:$0xff] (!%p271_p3)   ;;  %vm2128_vm6 = vcmask (!%p271_p3), 1041408   ;;  %vm1912_vm7 = vcmask (!%p271_p3), 1044480   ;;  %vm2112_vm8 = vcmask (!%p271_p3), 31744  }
   0xb   : > { %v3244_v22 = vld [vmem:[%s4065_s1 + $0x30] sm:$0xff] (!%p271_p3)   ;;  %v3246_v24 = vld [vmem:[%s4065_s1 + $0x38] sm:$0xff] (!%p271_p3)   ;;  %v3250_v32 = vld [vmem:[%s4065_s1 + $0xc0] sm:$0xff] (!%p271_p3)  }
   0xc   : > { %2860 = vmatpush3.bf16.msra.mxu0 (!%p271_p3), %v3233_v3  ;;  %v3251_v33 = vld [vmem:[%s4065_s1 + $0x88] sm:$0xff] (!%p271_p3)   ;;  %v3254_v38 = vld [vmem:[%s4065_s1 + $0x90] sm:$0xff] (!%p271_p3)   ;;  %v3257_v43 = vld [vmem:[%s4065_s1 + $0x98] sm:$0xff] (!%p271_p3)  }
   0xd   : > { %2896 = vmatpush3.bf16.msra.mxu1 (!%p271_p3), %v3234_v4  ;;  %2861 = vmatprep.subr.bf16.mxu0 (!%p271_p3), %v3355_v1  ;;  %v3253_v37 = vld [vmem:[%s4065_s1 + $0xc8] sm:$0xff] (!%p271_p3)   ;;  %v3255_v42 = vld [vmem:[%s4065_s1 + $0xd0] sm:$0xff] (!%p271_p3)   ;;  %v3258_v47 = vld [vmem:[%s4065_s1 + $0xd8] sm:$0xff] (!%p271_p3)  }
   0xe   : > { %s4076_s21 = smov (!%p322_p4, %s3345_s21), 1  ;;  %2897 = vmatprep.subr.bf16.mxu1 %v3355_v1  ;;  %v3259_v48 = vld [vmem:[%s4065_s1 + $0xa0] sm:$0xff]   ;;  %v3262_v56 = vld [vmem:[%s4065_s1 + $0xa8] sm:$0xff]   ;;  %v3264_v61 = vld [vmem:[%s4065_s1 + $0xb0] sm:$0xff]  }
   0xf   : > { %s3203_s13 = smul.u32 56, %s4076_s21  ;;  %v3261_v52 = vld [vmem:[%s4065_s1 + $0xe0] sm:$0xff]   ;;  %v3263_v57 = vld [vmem:[%s4065_s1 + $0xe8] sm:$0xff]   ;;  %v3266_v62 = vld [vmem:[%s4065_s1 + $0xf0] sm:$0xff]  }
  0x10   : > { %2862 = vmatpush3.bf16.msra.mxu0 %v3235_v5  ;;  %v3267_v63 = vld [vmem:[%s4065_s1 + $0xb8] sm:$0xff]   ;;  %s3204_s16 = smul.u32 40, %s4076_s21 }
  0x11   : > { %2898 = vmatpush3.bf16.msra.mxu1 %v3236_v6  ;;  %2863 = vmatprep.subr.bf16.mxu0 %v3355_v1  ;;  %s3452_s20 = scalar_lea.vmem %s4064_s0, %s3203_s13  ;;  %v3268_v4 = vld [vmem:[%s4065_s1 + $0xf8] sm:$0xff]  }
  0x12   : > { %2899 = vmatprep.subr.bf16.mxu1 %v3355_v1  ;;  %v356_v11 = vld [vmem:[%s3452_s20] sm:$0xf]  ;;  %v3464_v12 = vld [vmem:[%s3452_s20 + $0x4] sm:$0xf]  ;;  %v3471_v15 = vld [vmem:[%s3452_s20 + $0x8] sm:$0xff]   ;;  %s3721_s28 = scalar_lea.vmem %s4067_s3, %s3204_s16  ;;  %s4027_s12 = scalar_lea.vmem %s4070_s6, %s3204_s16 }
  0x13   : > { %v2464_v14 = vcombine.low %v356_v11, %v3464_v12  ;;  %v437_v21 = vshll.u32 %v3471_v15, 16  ;;  %v3494_v27 = vld [vmem:[%s3452_s20 + $0x10] sm:$0xff]   ;;  %v441_v30 = vshrl.u32 %v3471_v15, 16  ;;  %v3513_v36 = vld [vmem:[%s3452_s20 + $0x18] sm:$0xff]   ;;  %v3540_v46 = vld [vmem:[%s3452_s20 + $0x20] sm:$0xff]  }
  0x14   : > { %2864 = vmatpush3.bf16.msra.mxu0 %v3237_v7  ;;  %v445_v31 = vshll.u32 %v3494_v27, 16  ;;  %v449_v40 = vshrl.u32 %v3494_v27, 16  ;;  %v453_v41 = vshll.u32 %v3513_v36, 16  ;;  %v457_v50 = vshrl.u32 %v3513_v36, 16  ;;  %v725_v0 = vld [vmem:[%s3452_s20] sm:$0xe] }
  0x15   : > { %2900 = vmatpush3.bf16.msra.mxu1 %v3238_v8  ;;  %2865 = vmatprep.subr.bf16.mxu0 %v3355_v1  ;;  %v432_v17 = vshll.u32 %v2464_v14, 16  ;;  %v430_v19 = vshrl.u32 %v2464_v14, 16  ;;  %v439_v26 = vrot.slane %v437_v21, 1  ;;  %v461_v51 = vshll.u32 %v3540_v46, 16  ;;  %v894_v5 = vld [vmem:[%s3452_s20 + $0x4] sm:$0xe] }
  0x16   : > { %2901 = vmatprep.subr.bf16.mxu1 %v3355_v1  ;;  %v447_v35 = vrot.slane %v445_v31, 1  ;;  %v455_v45 = vrot.slane %v453_v41, 1  ;;  %v3562_v53 = vld [vmem:[%s3452_s20 + $0x28] ss:$0 sps:$4 sm:$0x11]   ;;  %v465_v59 = vshrl.u32 %v3540_v46, 16  ;;  %v2502_v8 = vcombine.low %v725_v0, %v3464_v12 }
  0x17   : > { %v434_v20 = vrot.slane %v432_v17, 1  ;;  %v443_v34 = vor.u32 %v441_v30, %v439_v26  ;;  %v463_v55 = vrot.slane %v461_v51, 1  ;;  %v469_v60 = vshll.u32 %v3562_v53, 16  ;;  %v3604_v6 = vld [vmem:[%s3452_s20 + $0x8] sm:$0xf]  ;;  %v3279_v30 = vld [vmem:[%s4065_s1 + $0x118] sm:$0xff]  }
  0x18   : > { %2866 = vmatpush3.bf16.msra.mxu0 %v3239_v9  ;;  %v451_v44 = vor.u32 %v449_v40, %v447_v35  ;;  %v459_v54 = vor.u32 %v457_v50, %v455_v45  ;;  %v3610_v9 = vcombine.low %v894_v5, %v3604_v6  ;;  %v747_v11 = vrot.slane %v2502_v8, 1  ;;  %v3286_v41 = vld [vmem:[%s4065_s1 + $0x168] sm:$0xff]  }
  0x19   : > { %2902 = vmatpush3.bf16.msra.mxu1 %v3240_v10  ;;  %2867 = vmatprep.subr.bf16.mxu0 %v3355_v1  ;;  %v435_v25 = vor.u32 %v434_v20, %v430_v19  ;;  %v448_v39 = vsel %vm428_vm1, %v443_v34, %v447_v35  ;;  %v467_v2 = vor.u32 %v465_v59, %v463_v55  ;;  %v471_v3 = vrot.slane %v469_v60, 1  ;;  %v3613_v10 = vld [vmem:[%s3452_s20 + $0xc] sm:$0xff]   ;;  %v3282_v34 = vld [vmem:[%s4065_s1 + $0x120] sm:$0xff]  }
  0x1a   : > { %2903 = vmatprep.subr.bf16.mxu1 %v3355_v1  ;;  %v456_v49 = vsel %vm428_vm1, %v451_v44, %v455_v45  ;;  %v464_v58 = vsel %vm428_vm1, %v459_v54, %v463_v55  ;;  %v748_v12 = vrot.slane %v3471_v15, 1  ;;  %v3274_v20 = vld [vmem:[%s4065_s1 + $0x108] sm:$0xff]   ;;  %v750_v21 = vrot.slane %v3494_v27, 1  ;;  %v3287_v44 = vld [vmem:[%s4065_s1 + $0x130] sm:$0xff]   ;;  %v3291_v54 = vld [vmem:[%s4065_s1 + $0x178] sm:$0xff]  }
  0x1b   : > { %v440_v29 = vsel %vm428_vm1, %v435_v25, %v439_v26  ;;  %v472_v7 = vsel %vm428_vm1, %v467_v2, %v471_v3  ;;  %v3277_v25 = vld [vmem:[%s4065_s1 + $0x110] sm:$0xff]   ;;  %v3288_v45 = vld [vmem:[%s3452_s20 + $0x2c] ss:$0 sps:$4 sm:$0x11]   ;;  %v1128_v50 = vshrl.u32 %v3613_v10, 16  ;;  %v1131_v51 = vshll.u32 %v3613_v10, 16 }
  0x1c   : > { %2868 = vmatpush3.bf16.msra.mxu0 %v3241_v13  ;;  %v950_v13 = vrot.slane %v3610_v9, 1  ;;  %v749_v17 = vsel %vm746_vm2, %v747_v11, %v748_v12  ;;  %v1308_v55 = vld [vmem:[%s3452_s20 + $0x4] sm:$0xc]  ;;  %v1331_v5 = vrot.slane %v3613_v10, 2 }
  0x1d   : > { %2904 = vmatpush3.bf16.msra.mxu1 %v3242_v16  ;;  %2869 = vmatprep.subr.bf16.mxu0 %v3355_v1  ;;  %v3270_v16 = vld [vmem:[%s4065_s1 + $0x100] sm:$0xff]   ;;  %v1130_v59 = vrot.slane %v1128_v50, 1  ;;  %v1133_v60 = vrot.slane %v1131_v51, 2  ;;  %v3837_v51 = vld [vmem:[%s3452_s20 + $0x10] sm:$0xff]  }
  0x1e   : > { %2905 = vmatprep.subr.bf16.mxu1 %v3355_v1 }
  0x1f   : > { %v1134_v0 = vor.u32 %v1133_v60, %v1130_v59  ;;  %v1714_v59 = vshll.u32 %v3837_v51, 16  ;;  %v3309_v60 = vld [vmem:[%s4065_s1 + $0x1f8] sm:$0xff]  }
  0x20   : > { %2870 = vmatpush3.bf16.msra.mxu0 %v3243_v18  ;;  %v3630_v18 = vld [vmem:[%s3452_s20 + $0x14] sm:$0xff]  }
  0x21   : > { %2906 = vmatpush3.bf16.msra.mxu1 %v3244_v22  ;;  %2871 = vmatprep.subr.bf16.mxu0 %v3355_v1  ;;  %v953_v22 = vrot.slane %v3630_v18, 1  ;;  %v1137_v2 = vshrl.u32 %v3630_v18, 16  ;;  %v1140_v3 = vshll.u32 %v3630_v18, 16 }
  0x22   : > { %2907 = vmatprep.subr.bf16.mxu1 %v3355_v1 }
  0x23   : > { %v1139_v8 = vrot.slane %v1137_v2, 1 }
  0x24   : > { %2872 = vmatpush3.bf16.msra.mxu0 %v3245_v23  ;;  %v3276_v23 = vld [vmem:[%s4065_s1 + $0x148] sm:$0xff]  }
  0x25   : > { %2908 = vmatpush3.bf16.msra.mxu1 %v3246_v24  ;;  %2929 = vmatprep.subr.bf16.mxu0 %v3355_v1  ;;  %v751_v24 = vsel %vm746_vm2, %v748_v12, %v750_v21  ;;  %v3294_v12 = vld [vmem:[%s4065_s1 + $0x1c0] sm:$0xff]  }
  0x26   : > { %2965 = vmatprep.subr.bf16.mxu1 %v3355_v1 }
  0x27   : > { %2874 = vmatmul.mubr.bf16.vlgmr.msra.gmra.mrb[0].mxu0 %v440_v29  ;;  %v752_v29 = vrot.slane %v3513_v36, 1 }
  0x28   : > { %2910 = vmatmul.mubr.bf16.vlgmr.msra.gmra.mrb[0].mxu1 %v2464_v14  ;;  %2930 = vmatpush3.bf16.msra.mxu0 %v3249_v28  ;;  %v951_v14 = vrot.slane %v3613_v10, 1  ;;  %v3278_v28 = vld [vmem:[%s4065_s1 + $0x150] sm:$0xff]   ;;  %v3295_v10 = vld [vmem:[%s4065_s1 + $0x188] sm:$0xff]  }
  0x29   : > { %2931 = vmatprep.subr.bf16.mxu0 %v3355_v1  ;;  %2966 = vmatpush3.bf16.msra.mxu1 %v3250_v32  ;;  %v3281_v32 = vld [vmem:[%s4065_s1 + $0x158] sm:$0xff]  }
  0x2a   : > { %2877 = vmatprep.mubr.msk.bf16.mxu0 %vm3356_vm0, %v3355_v1  ;;  %2913 = vmatprep.mubr.msk.bf16.mxu1 %vm3356_vm0, %v3355_v1  ;;  %v952_v19 = vsel %vm746_vm2, %v950_v13, %v951_v14  ;;  %v954_v26 = vsel %vm746_vm2, %v951_v14, %v953_v22 }
  0x2b   : > { %2967 = vmatprep.subr.bf16.mxu1 %v3355_v1 }
  0x2c   : > { %2932 = vmatpush3.bf16.msra.mxu0 %v3251_v33  ;;  %v753_v33 = vsel %vm746_vm2, %v750_v21, %v752_v29 }
  0x2d   : > { %2933 = vmatprep.subr.bf16.mxu0 %v3355_v1  ;;  %2968 = vmatpush3.bf16.msra.mxu1 %v3253_v37  ;;  %v3687_v37 = vld [vmem:[%s3452_s20 + $0x24] sm:$0xff]  }
  0x2e   : > { %2969 = vmatprep.subr.bf16.mxu1 %v3355_v1  ;;  %v957_v40 = vrot.slane %v3687_v37, 1 }
  0x2f   : > { %2878 = vmatmul.mubr.bf16.gmra.mrb[4].mxu0 %v448_v39  ;;  %v3285_v39 = vld [vmem:[%s4065_s1 + $0x128] sm:$0xff]  }
  0x30   : > { %2914 = vmatmul.mubr.bf16.gmra.mrb[4].mxu1 %v3471_v15  ;;  %2934 = vmatpush3.bf16.msra.mxu0 %v3254_v38  ;;  %v3273_v15 = vld [vmem:[%s4065_s1 + $0x140] sm:$0xff]   ;;  %v754_v38 = vrot.slane %v3540_v46, 1 }
  0x31   : > { %2881 = vmatprep.mubr.msk.bf16.mxu0 %vm3356_vm0, %v3355_v1  ;;  %2917 = vmatprep.mubr.msk.bf16.mxu1 %vm3356_vm0, %v3355_v1 }
  0x32   : > { %2935 = vmatprep.subr.bf16.mxu0 %v3355_v1  ;;  %2970 = vmatpush3.bf16.msra.mxu1 %v3255_v42  ;;  %v755_v42 = vsel %vm746_vm2, %v752_v29, %v754_v38 }
  0x33   : > { %2971 = vmatprep.subr.bf16.mxu1 %v3355_v1 }
  0x34   : > { %2936 = vmatpush3.bf16.msra.mxu0 %v3257_v43 }
  0x35   : > { %2937 = vmatprep.subr.bf16.mxu0 %v3355_v1 }
  0x36   : > { %2972 = vmatpush3.bf16.msra.mxu1 %v3258_v47  ;;  %v3289_v47 = vld [vmem:[%s4065_s1 + $0x170] sm:$0xff]  }
  0x37   : > { %2882 = vmatmul.mubr.bf16.gmra.mrb[8].mxu0 %v456_v49  ;;  %2973 = vmatprep.subr.bf16.mxu1 %v3355_v1  ;;  %v1123_v49 = vshll.u32 %v3610_v9, 16 }
  0x38   : > { %2918 = vmatmul.mubr.bf16.gmra.mrb[8].mxu1 %v3494_v27  ;;  %2938 = vmatpush3.bf16.msra.mxu0 %v3259_v48  ;;  %v3657_v27 = vld [vmem:[%s3452_s20 + $0x1c] sm:$0xff]   ;;  %v1120_v48 = vshrl.u32 %v3610_v9, 16  ;;  %v1142_v9 = vrot.slane %v1140_v3, 2  ;;  %v1716_v3 = vrot.slane %v1714_v59, 3 }
  0x39   : > { %2885 = vmatprep.mubr.msk.bf16.mxu0 %vm3356_vm0, %v3355_v1  ;;  %2921 = vmatprep.mubr.msk.bf16.mxu1 %vm3356_vm0, %v3355_v1  ;;  %v955_v31 = vrot.slane %v3657_v27, 1  ;;  %v1146_v14 = vshrl.u32 %v3657_v27, 16  ;;  %v1335_v29 = vrot.slane %v3657_v27, 2 }
  0x3a   : > { %2939 = vmatprep.subr.bf16.mxu0 %v3355_v1  ;;  %2974 = vmatpush3.bf16.msra.mxu1 %v3261_v52  ;;  %v959_v52 = vrot.slane %v3288_v45, 1  ;;  %v1143_v13 = vor.u32 %v1142_v9, %v1139_v8  ;;  %v3826_v45 = vld [vmem:[%s3452_s20 + $0xc] sm:$0xf] }
  0x3b   : > { %2975 = vmatprep.subr.bf16.mxu1 %v3355_v1  ;;  %v956_v35 = vsel %vm746_vm2, %v953_v22, %v955_v31  ;;  %v958_v43 = vsel %vm746_vm2, %v955_v31, %v957_v40 }
  0x3c   : > { %2940 = vmatpush3.bf16.msra.mxu0 %v3262_v56 }
  0x3d   : > { %2941 = vmatprep.subr.bf16.mxu0 %v3355_v1 }
  0x3e   : > { %2976 = vmatpush3.bf16.msra.mxu1 %v3263_v57  ;;  %v1122_v57 = vrot.slane %v1120_v48, 1 }
  0x3f   : > { %2886 = vmatmul.mubr.bf16.gmra.mrb[12].mxu0 %v464_v58  ;;  %2977 = vmatprep.subr.bf16.mxu1 %v3355_v1  ;;  %v1125_v58 = vrot.slane %v1123_v49, 2 }
  0x40   : > { %2922 = vmatmul.mubr.bf16.gmra.mrb[12].mxu1 %v3513_v36  ;;  %2889 = vmatprep.mubr.msk.bf16.mxu0 %vm3356_vm0, %v3355_v1  ;;  %v3283_v36 = vld [vmem:[%s4065_s1 + $0x160] sm:$0xff]  }
  0x41   : > { %2925 = vmatprep.mubr.msk.bf16.mxu1 %vm3356_vm0, %v3355_v1  ;;  %2942 = vmatpush3.bf16.msra.mxu0 %v3264_v61  ;;  %v960_v61 = vsel %vm746_vm2, %v957_v40, %v959_v52  ;;  %v3307_v52 = vld [vmem:[%s4065_s1 + $0x1f0] sm:$0xff]  }
  0x42   : > { %2943 = vmatprep.subr.bf16.mxu0 %v3355_v1  ;;  %2978 = vmatpush3.bf16.msra.mxu1 %v3266_v62  ;;  %v2582_v62 = vcombine.low %v1308_v55, %v3604_v6  ;;  %v3308_v55 = vld [vmem:[%s4065_s1 + $0x1b8] sm:$0xff]  }
  0x43   : > { %2979 = vmatprep.subr.bf16.mxu1 %v3355_v1 }
  0x45   : > { %2944 = vmatpush3.bf16.msra.mxu0 %v3267_v63  ;;  %v1126_v63 = vor.u32 %v1125_v58, %v1122_v57  ;;  %v1711_v58 = vshrl.u32 %v3837_v51, 16 }
  0x46   : > { %2980 = vmatpush3.bf16.msra.mxu1 %v3268_v4  ;;  %3001 = vmatprep.subr.bf16.mxu0 %v3355_v1  ;;  %v1330_v4 = vrot.slane %v2582_v62, 2 }
  0x47   : > { %2890 = vmatmul.mubr.bf16.gmra.mrb[16].mxu0 %v472_v7  ;;  %3037 = vmatprep.subr.bf16.mxu1 %v3355_v1  ;;  %v1135_v6 = vsel %vm1118_vm3, %v1126_v63, %v1134_v0  ;;  %v3292_v7 = vld [vmem:[%s4065_s1 + $0x180] sm:$0xff]   ;;  %v1713_v2 = vrot.slane %v1711_v58, 2 }
  0x48   : > { %2926 = vmatmul.mubr.bf16.gmra.mrb[16].mxu1 %v3540_v46  ;;  %2945 = vmatprep.mubr.msk.bf16.mxu0 %vm3356_vm0, %v3355_v1  ;;  %v756_v46 = vrot.slane %v3562_v53, 1  ;;  %v3290_v53 = vld [vmem:[%s4065_s1 + $0x138] sm:$0xff]   ;;  %v1332_v11 = vsel %vm1329_vm4, %v1330_v4, %v1331_v5 }
  0x49   : > { %2981 = vmatprep.mubr.msk.bf16.mxu1 %vm3356_vm0, %v3355_v1  ;;  %v3860_v4 = vld [vmem:[%s3452_s20 + $0x18] sm:$0xff]   ;;  %v1717_v8 = vor.u32 %v1716_v3, %v1713_v2  ;;  %v3327_v2 = vld [vmem:[%s3721_s28 + $0x8] sm:$0xff]  }
  0x4a   : > { %v757_v56 = vsel %vm746_vm2, %v754_v38, %v756_v46  ;;  %v1720_v9 = vshrl.u32 %v3860_v4, 16 }
  0x4f   : > { %2946 = vmatmul.mubr.bf16.vlgmr.msra.gmra.mrb[20].mxu0 %v749_v17  ;;  %v1333_v17 = vrot.slane %v3630_v18, 2  ;;  %v1148_v18 = vrot.slane %v1146_v14, 1 }
  0x50   : > { %3002 = vmatpush3.bf16.msra.mxu0 %v3270_v16  ;;  %2982 = vmatmul.mubr.bf16.vlgmr.msra.gmra.mrb[20].mxu1 %v952_v19  ;;  %v1149_v16 = vshll.u32 %v3657_v27, 16  ;;  %v3296_v19 = vld [vmem:[%s4065_s1 + $0x1c8] sm:$0xff]  }
  0x51   : > { %3003 = vmatprep.subr.bf16.mxu0 %v3355_v1  ;;  %3038 = vmatpush3.bf16.msra.mxu1 %v3273_v15  ;;  %v1144_v15 = vsel %vm1118_vm3, %v1134_v0, %v1143_v13  ;;  %v1334_v22 = vsel %vm1329_vm4, %v1331_v5, %v1333_v17  ;;  %v3306_v27 = vld [vmem:[%s3452_s20 + $0x2c] ss:$0 sps:$4 sm:$0x33]  }
  0x52   : > { %2949 = vmatprep.mubr.msk.bf16.mxu0 %vm3356_vm0, %v3355_v1  ;;  %2985 = vmatprep.mubr.msk.bf16.mxu1 %vm3356_vm0, %v3355_v1  ;;  %v1151_v21 = vrot.slane %v1149_v16, 2  ;;  %v1164_v40 = vshrl.u32 %v3306_v27, 16  ;;  %v1722_v16 = vrot.slane %v1720_v9, 2 }
  0x53   : > { %3039 = vmatprep.subr.bf16.mxu1 %v3355_v1 }
  0x54   : > { %3004 = vmatpush3.bf16.msra.mxu0 %v3274_v20  ;;  %v3297_v20 = vld [vmem:[%s4065_s1 + $0x190] sm:$0xff]  }
  0x55   : > { %3005 = vmatprep.subr.bf16.mxu0 %v3355_v1  ;;  %3040 = vmatpush3.bf16.msra.mxu1 %v3276_v23  ;;  %v3298_v23 = vld [vmem:[%s4065_s1 + $0x1d0] sm:$0xff]  }
  0x56   : > { %3041 = vmatprep.subr.bf16.mxu1 %v3355_v1 }
  0x57   : > { %2950 = vmatmul.mubr.bf16.gmra.mrb[24].mxu0 %v751_v24  ;;  %v1152_v24 = vor.u32 %v1151_v21, %v1148_v18  ;;  %v1536_v18 = vrot.slane %v3860_v4, 2 }
  0x58   : > { %2986 = vmatmul.mubr.bf16.gmra.mrb[24].mxu1 %v954_v26  ;;  %3006 = vmatpush3.bf16.msra.mxu0 %v3277_v25  ;;  %v3299_v25 = vld [vmem:[%s4065_s1 + $0x198] sm:$0xff]   ;;  %v1155_v26 = vshrl.u32 %v3687_v37, 16 }
  0x59   : > { %2953 = vmatprep.mubr.msk.bf16.mxu0 %vm3356_vm0, %v3355_v1  ;;  %3007 = vmatprep.subr.bf16.mxu0 %v3355_v1  ;;  %v1153_v31 = vsel %vm1118_vm3, %v1143_v13, %v1152_v24  ;;  %v3312_v13 = vld [vmem:[%s4065_s1 + $0x200] sm:$0xff]  }
  0x5a   : > { %3042 = vmatpush3.bf16.msra.mxu1 %v3278_v28  ;;  %2989 = vmatprep.mubr.msk.bf16.mxu1 %vm3356_vm0, %v3355_v1  ;;  %v1158_v28 = vshll.u32 %v3687_v37, 16 }
  0x5b   : > { %3043 = vmatprep.subr.bf16.mxu1 %v3355_v1 }
  0x5c   : > { %3008 = vmatpush3.bf16.msra.mxu0 %v3279_v30  ;;  %v3300_v30 = vld [vmem:[%s4065_s1 + $0x1d8] sm:$0xff]  }
  0x5d   : > { %3009 = vmatprep.subr.bf16.mxu0 %v3355_v1 }
  0x5e   : > { %3044 = vmatpush3.bf16.msra.mxu1 %v3281_v32  ;;  %v3301_v32 = vld [vmem:[%s4065_s1 + $0x1a0] sm:$0xff]  }
  0x5f   : > { %2954 = vmatmul.mubr.bf16.gmra.mrb[28].mxu0 %v753_v33  ;;  %3045 = vmatprep.subr.bf16.mxu1 %v3355_v1  ;;  %v1157_v33 = vrot.slane %v1155_v26, 1 }
  0x60   : > { %2990 = vmatmul.mubr.bf16.gmra.mrb[28].mxu1 %v956_v35  ;;  %3010 = vmatpush3.bf16.msra.mxu0 %v3282_v34  ;;  %v1160_v34 = vrot.slane %v1158_v28, 2  ;;  %v1336_v35 = vsel %vm1329_vm4, %v1333_v17, %v1335_v29 }
  0x61   : > { %2957 = vmatprep.mubr.msk.bf16.mxu0 %vm3356_vm0, %v3355_v1  ;;  %2993 = vmatprep.mubr.msk.bf16.mxu1 %vm3356_vm0, %v3355_v1 }
  0x62   : > { %3011 = vmatprep.subr.bf16.mxu0 %v3355_v1  ;;  %3046 = vmatpush3.bf16.msra.mxu1 %v3283_v36  ;;  %v3302_v36 = vld [vmem:[%s4065_s1 + $0x1e0] sm:$0xff]   ;;  %v1161_v38 = vor.u32 %v1160_v34, %v1157_v33 }
  0x63   : > { %3047 = vmatprep.subr.bf16.mxu1 %v3355_v1 }
  0x64   : > { %3012 = vmatpush3.bf16.msra.mxu0 %v3285_v39  ;;  %v3303_v39 = vld [vmem:[%s4065_s1 + $0x1a8] sm:$0xff]   ;;  %v1162_v46 = vsel %vm1118_vm3, %v1152_v24, %v1161_v38 }
  0x65   : > { %3013 = vmatprep.subr.bf16.mxu0 %v3355_v1 }
  0x66   : > { %3048 = vmatpush3.bf16.msra.mxu1 %v3286_v41  ;;  %v1167_v41 = vshll.u32 %v3306_v27, 16 }
  0x67   : > { %2958 = vmatmul.mubr.bf16.gmra.mrb[32].mxu0 %v755_v42  ;;  %3049 = vmatprep.subr.bf16.mxu1 %v3355_v1  ;;  %v1337_v42 = vrot.slane %v3687_v37, 2  ;;  %v3305_v37 = vld [vmem:[%s4065_s1 + $0x1b0] sm:$0xff]  }
  0x68   : > { %2994 = vmatmul.mubr.bf16.gmra.mrb[32].mxu1 %v958_v43  ;;  %2961 = vmatprep.mubr.msk.bf16.mxu0 %vm3356_vm0, %v3355_v1  ;;  %v3304_v43 = vld [vmem:[%s4065_s1 + $0x1e8] sm:$0xff]   ;;  %v1169_v48 = vrot.slane %v1167_v41, 2  ;;  %v3920_v41 = vld [vmem:[%s3452_s20 + $0x30] ss:$0 sps:$4 sm:$0x77]  }
  0x69   : > { %3014 = vmatpush3.bf16.msra.mxu0 %v3287_v44  ;;  %2997 = vmatprep.mubr.msk.bf16.mxu1 %vm3356_vm0, %v3355_v1  ;;  %v1477_v44 = vld [vmem:[%s3452_s20 + $0x8] sm:$0xc]  ;;  %v1338_v49 = vsel %vm1329_vm4, %v1335_v29, %v1337_v42  ;;  %v1922_v9 = vrot.slane %v3920_v41, 3 }
  0x6a   : > { %3015 = vmatprep.subr.bf16.mxu0 %v3355_v1  ;;  %3050 = vmatpush3.bf16.msra.mxu1 %v3289_v47  ;;  %v1166_v47 = vrot.slane %v1164_v40, 1  ;;  %v2607_v50 = vcombine.low %v1477_v44, %v3826_v45 }
  0x6b   : > { %3051 = vmatprep.subr.bf16.mxu1 %v3355_v1 }
  0x6c   : > { %v1706_v57 = vshll.u32 %v2607_v50, 16  ;;  %v1533_v5 = vrot.slane %v2607_v50, 2 }
  0x6d   : > { %3016 = vmatpush3.bf16.msra.mxu0 %v3290_v53  ;;  %v1170_v53 = vor.u32 %v1169_v48, %v1166_v47  ;;  %v1750_v47 = vshll.u32 %v3920_v41, 16 }
  0x6e   : > { %3052 = vmatpush3.bf16.msra.mxu1 %v3291_v54  ;;  %3073 = vmatprep.subr.bf16.mxu0 %v3355_v1  ;;  %v1339_v54 = vrot.slane %v3306_v27, 2  ;;  %v1708_v0 = vrot.slane %v1706_v57, 3  ;;  %v1891_v57 = vld [vmem:[%s3452_s20 + $0x8] sm:$0x8] }
  0x6f   : > { %2962 = vmatmul.mubr.bf16.gmra.mrb[36].mxu0 %v757_v56  ;;  %3109 = vmatprep.subr.bf16.mxu1 %v3355_v1  ;;  %v1703_v56 = vshrl.u32 %v2607_v50, 16  ;;  %v3321_v50 = vld [vmem:[%s4065_s1 + $0x230] sm:$0xff]   ;;  %v2662_v59 = vcombine.low %v1891_v57, %v3826_v45  ;;  %v3326_v45 = vld [vmem:[%s3721_s28] sm:$0xff]  }
  0x70   : > { %2998 = vmatmul.mubr.bf16.gmra.mrb[36].mxu1 %v960_v61  ;;  %3017 = vmatprep.mubr.msk.bf16.mxu0 %vm3356_vm0, %v3355_v1  ;;  %v1171_v61 = vsel %vm1118_vm3, %v1161_v38, %v1170_v53  ;;  %v1340_v62 = vsel %vm1329_vm4, %v1337_v42, %v1339_v54  ;;  %v1752_v53 = vrot.slane %v1750_v47, 3 }
  0x71   : > { %3053 = vmatprep.mubr.msk.bf16.mxu1 %vm3356_vm0, %v3355_v1  ;;  %v1705_v63 = vrot.slane %v1703_v56, 2  ;;  %v3324_v56 = vld [vmem:[%s4065_s1 + $0x238] sm:$0xff]  }
  0x77   : > { %3018 = vmatmul.mubr.bf16.vlgmr.msra.gmra.mrb[40].mxu0 %v1135_v6  ;;  %v1534_v6 = vrot.slane %v3837_v51, 2 }
  0x78   : > { %3074 = vmatpush3.bf16.msra.mxu0 %v3292_v7  ;;  %3054 = vmatmul.mubr.bf16.vlgmr.msra.gmra.mrb[40].mxu1 %v1332_v11  ;;  %v1709_v7 = vor.u32 %v1708_v0, %v1705_v63  ;;  %v1723_v11 = vshll.u32 %v3860_v4, 16  ;;  %v1916_v0 = vrot.slane %v3860_v4, 3 }
  0x79   : > { %3075 = vmatprep.subr.bf16.mxu0 %v3355_v1  ;;  %3110 = vmatpush3.bf16.msra.mxu1 %v3294_v12  ;;  %v2086_v12 = vld [vmem:[%s4068_s4] sm:$0x3]  ;;  %v1537_v24 = vsel %vm1329_vm4, %v1534_v6, %v1536_v18 }
  0x7a   : > { %3021 = vmatprep.mubr.msk.bf16.mxu0 %vm3356_vm0, %v3355_v1  ;;  %3057 = vmatprep.mubr.msk.bf16.mxu1 %vm3356_vm0, %v3355_v1  ;;  %v1718_v14 = vsel %vm1701_vm5, %v1709_v7, %v1717_v8  ;;  %v1725_v17 = vrot.slane %v1723_v11, 3 }
  0x7b   : > { %3111 = vmatprep.subr.bf16.mxu1 %v3355_v1 }
  0x7c   : > { %3076 = vmatpush3.bf16.msra.mxu0 %v3295_v10  ;;  %v1535_v10 = vsel %vm1329_vm4, %v1533_v5, %v1534_v6  ;;  %v1726_v21 = vor.u32 %v1725_v17, %v1722_v16  ;;  %v3328_v5 = vld [vmem:[%s3721_s28 + $0x10] sm:$0xff]  }
  0x7d   : > { %3077 = vmatprep.subr.bf16.mxu0 %v3355_v1  ;;  %3112 = vmatpush3.bf16.msra.mxu1 %v3296_v19  ;;  %v3880_v19 = vld [vmem:[%s3452_s20 + $0x20] sm:$0xff]  }
  0x7e   : > { %3113 = vmatprep.subr.bf16.mxu1 %v3355_v1  ;;  %v1727_v26 = vsel %vm1701_vm5, %v1717_v8, %v1726_v21  ;;  %v1918_v3 = vrot.slane %v3880_v19, 3  ;;  %v3329_v8 = vld [vmem:[%s3721_s28 + $0x18] sm:$0xff]  }
  0x7f   : > { %3022 = vmatmul.mubr.bf16.gmra.mrb[44].mxu0 %v1144_v15  ;;  %v2130_v15 = vsel %vm2128_vm6, %v2086_v12, 0  ;;  %v3330_v12 = vld [vmem:[%s3721_s28 + $0x20] sm:$0xff]  }
  0x80   : > { %3058 = vmatmul.mubr.bf16.gmra.mrb[44].mxu1 %v1334_v22  ;;  %3078 = vmatpush3.bf16.msra.mxu0 %v3297_v20  ;;  %v3313_v20 = vld [vmem:[%s4065_s1 + $0x208] sm:$0xff]   ;;  %v1729_v22 = vshrl.u32 %v3880_v19, 16  ;;  %v1919_v4 = vsel %vm1912_vm7, %v1916_v0, %v1918_v3 }
  0x81   : > { %3025 = vmatprep.mubr.msk.bf16.mxu0 %vm3356_vm0, %v3355_v1  ;;  %3079 = vmatprep.subr.bf16.mxu0 %v3355_v1 }
  0x82   : > { %3114 = vmatpush3.bf16.msra.mxu1 %v3298_v23  ;;  %3061 = vmatprep.mubr.msk.bf16.mxu1 %vm3356_vm0, %v3355_v1  ;;  %v1732_v23 = vshll.u32 %v3880_v19, 16  ;;  %v1731_v28 = vrot.slane %v1729_v22, 2 }
  0x83   : > { %3115 = vmatprep.subr.bf16.mxu1 %v3355_v1 }
  0x84   : > { %3080 = vmatpush3.bf16.msra.mxu0 %v3299_v25  ;;  %v3315_v25 = vld [vmem:[%s4065_s1 + $0x210] sm:$0xff]   ;;  %v1734_v29 = vrot.slane %v1732_v23, 3 }
  0x85   : > { %3081 = vmatprep.subr.bf16.mxu0 %v3355_v1 }
  0x86   : > { %3116 = vmatpush3.bf16.msra.mxu1 %v3300_v30  ;;  %v3900_v30 = vld [vmem:[%s3452_s20 + $0x28] sm:$0xff]   ;;  %v1735_v33 = vor.u32 %v1734_v29, %v1731_v28 }
  0x87   : > { %3026 = vmatmul.mubr.bf16.gmra.mrb[48].mxu0 %v1153_v31  ;;  %3117 = vmatprep.subr.bf16.mxu1 %v3355_v1  ;;  %v1538_v31 = vrot.slane %v3880_v19, 2  ;;  %v1738_v34 = vshrl.u32 %v3900_v30, 16  ;;  %v1741_v27 = vshll.u32 %v3900_v30, 16  ;;  %v1540_v42 = vrot.slane %v3900_v30, 2 }
  0x88   : > { %3062 = vmatmul.mubr.bf16.gmra.mrb[48].mxu1 %v1336_v35  ;;  %3082 = vmatpush3.bf16.msra.mxu0 %v3301_v32  ;;  %v3317_v32 = vld [vmem:[%s4065_s1 + $0x218] sm:$0xff]   ;;  %v1736_v38 = vsel %vm1701_vm5, %v1726_v21, %v1735_v33  ;;  %v1920_v6 = vrot.slane %v3900_v30, 3 }
  0x89   : > { %3029 = vmatprep.mubr.msk.bf16.mxu0 %vm3356_vm0, %v3355_v1  ;;  %3065 = vmatprep.mubr.msk.bf16.mxu1 %vm3356_vm0, %v3355_v1  ;;  %v1539_v35 = vsel %vm1329_vm4, %v1536_v18, %v1538_v31  ;;  %v1743_v40 = vrot.slane %v1741_v27, 3  ;;  %v1541_v48 = vsel %vm1329_vm4, %v1538_v31, %v1540_v42 }
  0x8a   : > { %3083 = vmatprep.subr.bf16.mxu0 %v3355_v1  ;;  %3118 = vmatpush3.bf16.msra.mxu1 %v3302_v36  ;;  %v3318_v36 = vld [vmem:[%s4065_s1 + $0x220] sm:$0xff]   ;;  %v1921_v7 = vsel %vm1912_vm7, %v1918_v3, %v1920_v6  ;;  %v1923_v11 = vsel %vm1912_vm7, %v1920_v6, %v1922_v9 }
  0x8b   : > { %3119 = vmatprep.subr.bf16.mxu1 %v3355_v1 }
  0x8c   : > { %3084 = vmatpush3.bf16.msra.mxu0 %v3303_v39  ;;  %v1740_v39 = vrot.slane %v1738_v34, 2 }
  0x8d   : > { %3085 = vmatprep.subr.bf16.mxu0 %v3355_v1 }
  0x8e   : > { %3120 = vmatpush3.bf16.msra.mxu1 %v3304_v43  ;;  %v3320_v43 = vld [vmem:[%s4065_s1 + $0x228] sm:$0xff]   ;;  %v1744_v44 = vor.u32 %v1743_v40, %v1740_v39 }
  0x8f   : > { %3030 = vmatmul.mubr.bf16.gmra.mrb[52].mxu0 %v1162_v46  ;;  %3121 = vmatprep.subr.bf16.mxu1 %v3355_v1  ;;  %v1747_v46 = vshrl.u32 %v3920_v41, 16 }
  0x90   : > { %3066 = vmatmul.mubr.bf16.gmra.mrb[52].mxu1 %v1338_v49  ;;  %3033 = vmatprep.mubr.msk.bf16.mxu0 %vm3356_vm0, %v3355_v1  ;;  %v3322_v49 = vld [vmem:[%s3452_s20 + $0x30] ss:$0 sps:$4 sm:$0x33]  }
  0x91   : > { %3086 = vmatpush3.bf16.msra.mxu0 %v3305_v37  ;;  %3069 = vmatprep.mubr.msk.bf16.mxu1 %vm3356_vm0, %v3355_v1  ;;  %v1745_v37 = vsel %vm1701_vm5, %v1735_v33, %v1744_v44  ;;  %v1542_v54 = vrot.slane %v3322_v49, 2 }
  0x92   : > { %3087 = vmatprep.subr.bf16.mxu0 %v3355_v1  ;;  %3122 = vmatpush3.bf16.msra.mxu1 %v3307_v52  ;;  %v1749_v52 = vrot.slane %v1747_v46, 2 }
  0x93   : > { %3123 = vmatprep.subr.bf16.mxu1 %v3355_v1  ;;  %v1543_v58 = vsel %vm1329_vm4, %v1540_v42, %v1542_v54 }
  0x95   : > { %3088 = vmatpush3.bf16.msra.mxu0 %v3308_v55  ;;  %v1753_v55 = vor.u32 %v1752_v53, %v1749_v52 }
  0x96   : > { %3124 = vmatpush3.bf16.msra.mxu1 %v3309_v60  ;;  %3145 = vmatprep.subr.bf16.mxu0 %v3355_v1 }
  0x97   : > { %3034 = vmatmul.mubr.bf16.gmra.mrb[56].mxu0 %v1171_v61  ;;  %3181 = vmatprep.subr.bf16.mxu1 %v3355_v1  ;;  %v1754_v60 = vsel %vm1701_vm5, %v1744_v44, %v1753_v55  ;;  %v1913_v61 = vrot.slane %v2662_v59, 3 }
  0x98   : > { %3070 = vmatmul.mubr.bf16.gmra.mrb[56].mxu1 %v1340_v62  ;;  %3089 = vmatprep.mubr.msk.bf16.mxu0 %vm3356_vm0, %v3355_v1  ;;  %v1914_v62 = vrot.slane %v3837_v51, 3 }
  0x99   : > { %3125 = vmatprep.mubr.msk.bf16.mxu1 %vm3356_vm0, %v3355_v1 }
  0x9a   : > { %v1915_v63 = vsel %vm1912_vm7, %v1913_v61, %v1914_v62  ;;  %v1917_v51 = vsel %vm1912_vm7, %v1914_v62, %v1916_v0 }
  0x9f   : > { %3090 = vmatmul.mubr.bf16.vlgmr.msra.gmra.mrb[60].mxu0 %v1535_v10 }
  0xa0   : > { %3146 = vmatpush3.bf16.msra.mxu0 %v3312_v13  ;;  %3126 = vmatmul.mubr.bf16.vlgmr.msra.gmra.mrb[60].mxu1 %v1718_v14 }
  0xa1   : > { %3147 = vmatprep.subr.bf16.mxu0 %v3355_v1  ;;  %3182 = vmatpush3.bf16.msra.mxu1 %v2130_v15 }
  0xa2   : > { %3093 = vmatprep.mubr.msk.bf16.mxu0 %vm3356_vm0, %v3355_v1  ;;  %3129 = vmatprep.mubr.msk.bf16.mxu1 %vm3356_vm0, %v3355_v1 }
  0xa4   : > { %3148 = vmatpush3.bf16.msra.mxu0 %v3313_v20 }
  0xa5   : > { %3149 = vmatprep.subr.bf16.mxu0 %v3355_v1 }
  0xa7   : > { %3094 = vmatmul.mubr.bf16.gmra.mrb[64].mxu0 %v1537_v24 }
  0xa8   : > { %3130 = vmatmul.mubr.bf16.gmra.mrb[64].mxu1 %v1727_v26  ;;  %3150 = vmatpush3.bf16.msra.mxu0 %v3315_v25 }
  0xa9   : > { %3097 = vmatprep.mubr.msk.bf16.mxu0 %vm3356_vm0, %v3355_v1  ;;  %3151 = vmatprep.subr.bf16.mxu0 %v3355_v1 }
  0xaa   : > { %3133 = vmatprep.mubr.msk.bf16.mxu1 %vm3356_vm0, %v3355_v1 }
  0xac   : > { %3152 = vmatpush3.bf16.msra.mxu0 %v3317_v32 }
  0xad   : > { %3153 = vmatprep.subr.bf16.mxu0 %v3355_v1 }
  0xaf   : > { %3098 = vmatmul.mubr.bf16.gmra.mrb[68].mxu0 %v1539_v35 }
  0xb0   : > { %3134 = vmatmul.mubr.bf16.gmra.mrb[68].mxu1 %v1736_v38  ;;  %3154 = vmatpush3.bf16.msra.mxu0 %v3318_v36 }
  0xb1   : > { %3101 = vmatprep.mubr.msk.bf16.mxu0 %vm3356_vm0, %v3355_v1  ;;  %3137 = vmatprep.mubr.msk.bf16.mxu1 %vm3356_vm0, %v3355_v1 }
  0xb2   : > { %3155 = vmatprep.subr.bf16.mxu0 %v3355_v1 }
  0xb4   : > { %3156 = vmatpush3.bf16.msra.mxu0 %v3320_v43 }
  0xb5   : > { %3157 = vmatprep.subr.bf16.mxu0 %v3355_v1 }
  0xb7   : > { %3102 = vmatmul.mubr.bf16.gmra.mrb[72].mxu0 %v1541_v48 }
  0xb8   : > { %3138 = vmatmul.mubr.bf16.gmra.mrb[72].mxu1 %v1745_v37  ;;  %3105 = vmatprep.mubr.msk.bf16.mxu0 %vm3356_vm0, %v3355_v1 }
  0xb9   : > { %3158 = vmatpush3.bf16.msra.mxu0 %v3321_v50  ;;  %3141 = vmatprep.mubr.msk.bf16.mxu1 %vm3356_vm0, %v3355_v1 }
  0xba   : > { %3159 = vmatprep.subr.bf16.mxu0 %v3355_v1 }
  0xbd   : > { %3160 = vmatpush3.bf16.msra.mxu0 %v3324_v56 }
  0xbf   : > { %3106 = vmatmul.mubr.bf16.gmra.mrb[76].mxu0 %v1543_v58 }
  0xc0   : > { %3142 = vmatmul.mubr.bf16.gmra.mrb[76].mxu1 %v1754_v60  ;;  %3161 = vmatprep.mubr.msk.bf16.mxu0 %vm3356_vm0, %v3355_v1 }
  0xc1   : > { %3183 = vmatprep.mubr.msk.bf16.mxu1 %vm3356_vm0, %v3355_v1 }
  0xc7   : > { %3162 = vmatmul.mubr.bf16.vlgmr.msra.gmra.mrb[80].mxu0 %v1915_v63 }
  0xc8   : > { %3184 = vmatmul.mubr.msk.bf16.vlgmr.msra.gmra.mrb[80].mxu1 %vm2112_vm8, %v3326_v45  ;;  %3165 = vmatprep.mubr.msk.bf16.mxu0 %vm3356_vm0, %v3355_v1 }
  0xc9   : > { %3187 = vmatprep.mubr.msk.bf16.mxu1 %vm3356_vm0, %v3355_v1 }
  0xcf   : > { %3166 = vmatmul.mubr.bf16.gmra.mrb[84].mxu0 %v1917_v51 }
  0xd0   : > { %3188 = vmatmul.mubr.msk.bf16.gmra.mrb[84].mxu1 %vm2112_vm8, %v3327_v2  ;;  %3169 = vmatprep.mubr.msk.bf16.mxu0 %vm3356_vm0, %v3355_v1 }
  0xd1   : > { %3191 = vmatprep.mubr.msk.bf16.mxu1 %vm3356_vm0, %v3355_v1 }
  0xd7   : > { %3170 = vmatmul.mubr.bf16.gmra.mrb[88].mxu0 %v1919_v4 }
  0xd8   : > { %3192 = vmatmul.mubr.msk.bf16.gmra.mrb[88].mxu1 %vm2112_vm8, %v3328_v5  ;;  %3173 = vmatprep.mubr.msk.bf16.mxu0 %vm3356_vm0, %v3355_v1 }
  0xd9   : > { %3195 = vmatprep.mubr.msk.bf16.mxu1 %vm3356_vm0, %v3355_v1 }
  0xdf   : > { %3174 = vmatmul.mubr.bf16.gmra.mrb[92].mxu0 %v1921_v7 }
  0xe0   : > { %3196 = vmatmul.mubr.msk.bf16.gmra.mrb[92].mxu1 %vm2112_vm8, %v3329_v8  ;;  %3177 = vmatprep.mubr.msk.bf16.mxu0 %vm3356_vm0, %v3355_v1 }
  0xe1   : > { %3199 = vmatprep.mubr.msk.bf16.mxu1 %vm3356_vm0, %v3355_v1 }
  0xe7   : > { %3178 = vmatmul.mubr.bf16.gmra.mrb[96].mxu0 %v1923_v11 }
  0xe8   : > { %3200 = vmatmul.mubr.msk.bf16.gmra.mrb[96].mxu1 %vm2112_vm8, %v3330_v12 }
  0xfa   : > { %v560_v10 = vpop.f32.mrb[0].mxu0 }
  0xfb   : > { %v686_v13 = vpop.f32.mrb[0].mxu1  ;;  %v2875_v14 = vpop.f32.mrb[1].mxu0 }
  0xfc   : > { %v687_v16 = vadd.f32 %v686_v13, %v560_v10  ;;  %v2911_v17 = vpop.f32.mrb[1].mxu1  ;;  %v563_v19 = vpop.f32.mrb[2].mxu0 }
  0xfd   : > { %v689_v15 = vpop.f32.mrb[2].mxu1  ;;  %v2876_v20 = vpop.f32.mrb[3].mxu0 }
  0xfe   : > { %v690_v18 = vadd.f32 %v689_v15, %v563_v19  ;;  %v2912_v21 = vpop.f32.mrb[3].mxu1 }
 0x102   : > { %v568_v22 = vpop.f32.mrb[4].mxu0 }
 0x103   : > { %v694_v23 = vpop.f32.mrb[4].mxu1  ;;  %v2879_v24 = vpop.f32.mrb[5].mxu0 }
 0x104   : > { %v695_v1 = vadd.f32 %v694_v23, %v568_v22  ;;  %v2915_v25 = vpop.f32.mrb[5].mxu1  ;;  %v571_v26 = vpop.f32.mrb[6].mxu0 }
 0x105   : > { %v697_v28 = vpop.f32.mrb[6].mxu1  ;;  %v2880_v29 = vpop.f32.mrb[7].mxu0 }
 0x106   : > { %v698_v30 = vadd.f32 %v697_v28, %v571_v26  ;;  %v2916_v31 = vpop.f32.mrb[7].mxu1 }
 0x10a   : > { %v576_v32 = vpop.f32.mrb[8].mxu0 }
 0x10b   : > { %v702_v33 = vpop.f32.mrb[8].mxu1  ;;  %v2883_v34 = vpop.f32.mrb[9].mxu0 }
 0x10c   : > { %v703_v27 = vadd.f32 %v702_v33, %v576_v32  ;;  %v2919_v35 = vpop.f32.mrb[9].mxu1  ;;  %v579_v36 = vpop.f32.mrb[10].mxu0 }
 0x10d   : > { %v705_v38 = vpop.f32.mrb[10].mxu1  ;;  %v2884_v39 = vpop.f32.mrb[11].mxu0 }
 0x10e   : > { %v706_v40 = vadd.f32 %v705_v38, %v579_v36  ;;  %v2920_v41 = vpop.f32.mrb[11].mxu1 }
 0x112   : > { %v584_v42 = vpop.f32.mrb[12].mxu0 }
 0x113   : > { %v710_v43 = vpop.f32.mrb[12].mxu1  ;;  %v2887_v44 = vpop.f32.mrb[13].mxu0 }
 0x114   : > { %v711_v46 = vadd.f32 %v710_v43, %v584_v42  ;;  %v2923_v47 = vpop.f32.mrb[13].mxu1  ;;  %v587_v48 = vpop.f32.mrb[14].mxu0 }
 0x115   : > { %v713_v49 = vpop.f32.mrb[14].mxu1  ;;  %v2888_v37 = vpop.f32.mrb[15].mxu0 }
 0x116   : > { %v714_v50 = vadd.f32 %v713_v49, %v587_v48  ;;  %v2924_v52 = vpop.f32.mrb[15].mxu1 }
 0x11a   : > { %v592_v53 = vpop.f32.mrb[16].mxu0 }
 0x11b   : > { %v718_v54 = vpop.f32.mrb[16].mxu1  ;;  %v2891_v55 = vpop.f32.mrb[17].mxu0 }
 0x11c   : > { %v719_v56 = vadd.f32 %v718_v54, %v592_v53  ;;  %v2927_v57 = vpop.f32.mrb[17].mxu1  ;;  %v595_v58 = vpop.f32.mrb[18].mxu0 }
 0x11d   : > { %v721_v59 = vpop.f32.mrb[18].mxu1  ;;  %v2892_v60 = vpop.f32.mrb[19].mxu0 }
 0x11e   : > { %v722_v61 = vadd.f32 %v721_v59, %v595_v58  ;;  %v2928_v62 = vpop.f32.mrb[19].mxu1 }
 0x122   : > { %v845_v63 = vpop.f32.mrb[20].mxu0 }
 0x123   : > { %v884_v45 = vadd.f32 %v845_v63, %v687_v16  ;;  %v2947_v0 = vpop.f32.mrb[21].mxu0  ;;  %v1048_v51 = vpop.f32.mrb[20].mxu1 }
 0x124   : > { %v848_v2 = vpop.f32.mrb[22].mxu0  ;;  %v2983_v3 = vpop.f32.mrb[21].mxu1 }
 0x125   : > { %v885_v4 = vadd.f32 %v848_v2, %v690_v18  ;;  %v1087_v5 = vadd.f32 %v1048_v51, %v884_v45  ;;  %v2948_v6 = vpop.f32.mrb[23].mxu0  ;;  %v1051_v7 = vpop.f32.mrb[22].mxu1 }
 0x126   : > { %v2984_v8 = vpop.f32.mrb[23].mxu1 }
 0x127   : > { %v1088_v9 = vadd.f32 %v1051_v7, %v885_v4 }
 0x12a   : > { %v853_v11 = vpop.f32.mrb[24].mxu0 }
 0x12b   : > { %v886_v12 = vadd.f32 %v853_v11, %v695_v1  ;;  %v2951_v10 = vpop.f32.mrb[25].mxu0  ;;  %v1056_v13 = vpop.f32.mrb[24].mxu1 }
 0x12c   : > { %v856_v14 = vpop.f32.mrb[26].mxu0  ;;  %v2987_v17 = vpop.f32.mrb[25].mxu1 }
 0x12d   : > { %v887_v19 = vadd.f32 %v856_v14, %v698_v30  ;;  %v1089_v15 = vadd.f32 %v1056_v13, %v886_v12  ;;  %v2952_v20 = vpop.f32.mrb[27].mxu0  ;;  %v1059_v16 = vpop.f32.mrb[26].mxu1 }
 0x12e   : > { %v2988_v21 = vpop.f32.mrb[27].mxu1 }
 0x12f   : > { %v1090_v22 = vadd.f32 %v1059_v16, %v887_v19 }
 0x132   : > { %v861_v23 = vpop.f32.mrb[28].mxu0 }
 0x133   : > { %v888_v24 = vadd.f32 %v861_v23, %v703_v27  ;;  %v2955_v18 = vpop.f32.mrb[29].mxu0  ;;  %v1064_v25 = vpop.f32.mrb[28].mxu1 }
 0x134   : > { %v864_v26 = vpop.f32.mrb[30].mxu0  ;;  %v2991_v28 = vpop.f32.mrb[29].mxu1 }
 0x135   : > { %v889_v29 = vadd.f32 %v864_v26, %v706_v40  ;;  %v1091_v31 = vadd.f32 %v1064_v25, %v888_v24  ;;  %v2956_v32 = vpop.f32.mrb[31].mxu0  ;;  %v1067_v1 = vpop.f32.mrb[30].mxu1 }
 0x136   : > { %v2992_v33 = vpop.f32.mrb[31].mxu1 }
 0x137   : > { %v1092_v34 = vadd.f32 %v1067_v1, %v889_v29 }
 0x13a   : > { %v869_v35 = vpop.f32.mrb[32].mxu0 }
 0x13b   : > { %v890_v36 = vadd.f32 %v869_v35, %v711_v46  ;;  %v2959_v30 = vpop.f32.mrb[33].mxu0  ;;  %v1072_v38 = vpop.f32.mrb[32].mxu1 }
 0x13c   : > { %v872_v39 = vpop.f32.mrb[34].mxu0  ;;  %v2995_v41 = vpop.f32.mrb[33].mxu1 }
 0x13d   : > { %v891_v42 = vadd.f32 %v872_v39, %v714_v50  ;;  %v1093_v43 = vadd.f32 %v1072_v38, %v890_v36  ;;  %v2960_v44 = vpop.f32.mrb[35].mxu0  ;;  %v1075_v27 = vpop.f32.mrb[34].mxu1 }
 0x13e   : > { %v2996_v47 = vpop.f32.mrb[35].mxu1 }
 0x13f   : > { %v1094_v48 = vadd.f32 %v1075_v27, %v891_v42 }
 0x142   : > { %v877_v49 = vpop.f32.mrb[36].mxu0 }
 0x143   : > { %v892_v37 = vadd.f32 %v877_v49, %v719_v56  ;;  %v2963_v40 = vpop.f32.mrb[37].mxu0  ;;  %v1080_v52 = vpop.f32.mrb[36].mxu1 }
 0x144   : > { %v880_v53 = vpop.f32.mrb[38].mxu0  ;;  %v2999_v54 = vpop.f32.mrb[37].mxu1 }
 0x145   : > { %v893_v55 = vadd.f32 %v880_v53, %v722_v61  ;;  %v1095_v57 = vadd.f32 %v1080_v52, %v892_v37  ;;  %v2964_v58 = vpop.f32.mrb[39].mxu0  ;;  %v1083_v46 = vpop.f32.mrb[38].mxu1 }
 0x146   : > { %v3000_v59 = vpop.f32.mrb[39].mxu1 }
 0x147   : > { %v1096_v60 = vadd.f32 %v1083_v46, %v893_v55 }
 0x14a   : > { %v1259_v62 = vpop.f32.mrb[40].mxu0 }
 0x14b   : > { %v1298_v63 = vadd.f32 %v1259_v62, %v1087_v5  ;;  %v3019_v50 = vpop.f32.mrb[41].mxu0  ;;  %v1428_v45 = vpop.f32.mrb[40].mxu1 }
 0x14c   : > { %v1262_v0 = vpop.f32.mrb[42].mxu0  ;;  %v3055_v51 = vpop.f32.mrb[41].mxu1 }
 0x14d   : > { %v1299_v2 = vadd.f32 %v1262_v0, %v1088_v9  ;;  %v1467_v3 = vadd.f32 %v1428_v45, %v1298_v63  ;;  %v3020_v4 = vpop.f32.mrb[43].mxu0  ;;  %v1431_v56 = vpop.f32.mrb[42].mxu1 }
 0x14e   : > { %v3056_v6 = vpop.f32.mrb[43].mxu1 }
 0x14f   : > { %v1468_v7 = vadd.f32 %v1431_v56, %v1299_v2 }
 0x152   : > { %v1267_v8 = vpop.f32.mrb[44].mxu0 }
 0x153   : > { %v1300_v11 = vadd.f32 %v1267_v8, %v1089_v15  ;;  %v3023_v61 = vpop.f32.mrb[45].mxu0  ;;  %v1436_v12 = vpop.f32.mrb[44].mxu1 }
 0x154   : > { %v1270_v10 = vpop.f32.mrb[46].mxu0  ;;  %v3059_v13 = vpop.f32.mrb[45].mxu1 }
 0x155   : > { %v1301_v14 = vadd.f32 %v1270_v10, %v1090_v22  ;;  %v1469_v17 = vadd.f32 %v1436_v12, %v1300_v11  ;;  %v3024_v19 = vpop.f32.mrb[47].mxu0  ;;  %v1439_v5 = vpop.f32.mrb[46].mxu1 }
 0x156   : > { %v3060_v20 = vpop.f32.mrb[47].mxu1 }
 0x157   : > { %v1470_v16 = vadd.f32 %v1439_v5, %v1301_v14 }
 0x15a   : > { %v1275_v21 = vpop.f32.mrb[48].mxu0 }
 0x15b   : > { %v1302_v23 = vadd.f32 %v1275_v21, %v1091_v31  ;;  %v3027_v9 = vpop.f32.mrb[49].mxu0  ;;  %v1444_v24 = vpop.f32.mrb[48].mxu1 }
 0x15c   : > { %v1278_v18 = vpop.f32.mrb[50].mxu0  ;;  %v3063_v25 = vpop.f32.mrb[49].mxu1 }
 0x15d   : > { %v1303_v26 = vadd.f32 %v1278_v18, %v1092_v34  ;;  %v1471_v28 = vadd.f32 %v1444_v24, %v1302_v23  ;;  %v3028_v29 = vpop.f32.mrb[51].mxu0  ;;  %v1447_v15 = vpop.f32.mrb[50].mxu1 }
 0x15e   : > { %v3064_v32 = vpop.f32.mrb[51].mxu1 }
 0x15f   : > { %v1472_v1 = vadd.f32 %v1447_v15, %v1303_v26 }
 0x162   : > { %v1283_v33 = vpop.f32.mrb[52].mxu0 }
 0x163   : > { %v1304_v35 = vadd.f32 %v1283_v33, %v1093_v43  ;;  %v3031_v22 = vpop.f32.mrb[53].mxu0  ;;  %v1452_v36 = vpop.f32.mrb[52].mxu1 }
 0x164   : > { %v1286_v30 = vpop.f32.mrb[54].mxu0  ;;  %v3067_v38 = vpop.f32.mrb[53].mxu1 }
 0x165   : > { %v1305_v39 = vadd.f32 %v1286_v30, %v1094_v48  ;;  %v1473_v41 = vadd.f32 %v1452_v36, %v1304_v35  ;;  %v3032_v42 = vpop.f32.mrb[55].mxu0  ;;  %v1455_v31 = vpop.f32.mrb[54].mxu1 }
 0x166   : > { %v3068_v44 = vpop.f32.mrb[55].mxu1 }
 0x167   : > { %v1474_v27 = vadd.f32 %v1455_v31, %v1305_v39 }
 0x16a   : > { %v1291_v47 = vpop.f32.mrb[56].mxu0 }
 0x16b   : > { %v1306_v49 = vadd.f32 %v1291_v47, %v1095_v57  ;;  %v3035_v34 = vpop.f32.mrb[57].mxu0  ;;  %v1460_v37 = vpop.f32.mrb[56].mxu1 }
 0x16c   : > { %v1294_v40 = vpop.f32.mrb[58].mxu0  ;;  %v3071_v52 = vpop.f32.mrb[57].mxu1 }
 0x16d   : > { %v1307_v53 = vadd.f32 %v1294_v40, %v1096_v60  ;;  %v1475_v54 = vadd.f32 %v1460_v37, %v1306_v49  ;;  %v3036_v55 = vpop.f32.mrb[59].mxu0  ;;  %v1463_v43 = vpop.f32.mrb[58].mxu1 }
 0x16e   : > { %v3072_v58 = vpop.f32.mrb[59].mxu1 }
 0x16f   : > { %v1476_v46 = vadd.f32 %v1463_v43, %v1307_v53  ;;  %v4009_v58 = vld [vmem:[%s4066_s2] ss:$0 sm:$0xff] }
 0x172   : > { %v1631_v59 = vpop.f32.mrb[60].mxu0 }
 0x173   : > { %v1670_v62 = vadd.f32 %v1631_v59, %v1467_v3  ;;  %v3091_v48 = vpop.f32.mrb[61].mxu0  ;;  %v1842_v63 = vpop.f32.mrb[60].mxu1 }
 0x174   : > { %v1634_v50 = vpop.f32.mrb[62].mxu0  ;;  %v3127_v45 = vpop.f32.mrb[61].mxu1 }
 0x175   : > { %v1671_v0 = vadd.f32 %v1634_v50, %v1468_v7  ;;  %v1881_v51 = vadd.f32 %v1842_v63, %v1670_v62  ;;  %v3092_v2 = vpop.f32.mrb[63].mxu0  ;;  %v1845_v57 = vpop.f32.mrb[62].mxu1 }
 0x176   : > { %v3128_v4 = vpop.f32.mrb[63].mxu1  ;;  %v4015_v2 = vld [vmem:[%s4069_s5] ss:$0 sm:$0xff] }
 0x177   : > { %v1882_v56 = vadd.f32 %v1845_v57, %v1671_v0 }
 0x17a   : > { %v1639_v6 = vpop.f32.mrb[64].mxu0 }
 0x17b   : > { %v1672_v8 = vadd.f32 %v1639_v6, %v1469_v17  ;;  %v3095_v60 = vpop.f32.mrb[65].mxu0  ;;  %v1850_v11 = vpop.f32.mrb[64].mxu1 }
 0x17c   : > { %v1642_v61 = vpop.f32.mrb[66].mxu0  ;;  %v3131_v12 = vpop.f32.mrb[65].mxu1 }
 0x17d   : > { %v1673_v10 = vadd.f32 %v1642_v61, %v1470_v16  ;;  %v1883_v13 = vadd.f32 %v1850_v11, %v1672_v8  ;;  %v3096_v14 = vpop.f32.mrb[67].mxu0  ;;  %v1853_v3 = vpop.f32.mrb[66].mxu1 }
 0x17e   : > { %v3132_v19 = vpop.f32.mrb[67].mxu1 }
 0x17f   : > { %v3992_v5 = vadd.f32 %v1853_v3, %v1673_v10 }
 0x182   : > { %v1647_v20 = vpop.f32.mrb[68].mxu0 }
 0x183   : > { %v1674_v7 = vadd.f32 %v1647_v20, %v1471_v28  ;;  %v3099_v21 = vpop.f32.mrb[69].mxu0  ;;  %v1858_v23 = vpop.f32.mrb[68].mxu1 }
 0x184   : > { %v1650_v9 = vpop.f32.mrb[70].mxu0  ;;  %v3135_v24 = vpop.f32.mrb[69].mxu1 }
 0x185   : > { %v1675_v18 = vadd.f32 %v1650_v9, %v1472_v1  ;;  %v3994_v25 = vadd.f32 %v1858_v23, %v1674_v7  ;;  %v3100_v17 = vpop.f32.mrb[71].mxu0  ;;  %v1861_v26 = vpop.f32.mrb[70].mxu1 }
 0x186   : > { %v3136_v29 = vpop.f32.mrb[71].mxu1 }
 0x187   : > { %v3996_v15 = vadd.f32 %v1861_v26, %v1675_v18 }
 0x18a   : > { %v1655_v16 = vpop.f32.mrb[72].mxu0 }
 0x18b   : > { %v1676_v32 = vadd.f32 %v1655_v16, %v1473_v41  ;;  %v3103_v33 = vpop.f32.mrb[73].mxu0  ;;  %v1866_v35 = vpop.f32.mrb[72].mxu1 }
 0x18c   : > { %v1658_v22 = vpop.f32.mrb[74].mxu0  ;;  %v3139_v36 = vpop.f32.mrb[73].mxu1 }
 0x18d   : > { %v1677_v30 = vadd.f32 %v1658_v22, %v1474_v27  ;;  %v3998_v28 = vadd.f32 %v1866_v35, %v1676_v32  ;;  %v3104_v38 = vpop.f32.mrb[75].mxu0  ;;  %v1869_v39 = vpop.f32.mrb[74].mxu1 }
 0x18e   : > { %v3140_v42 = vpop.f32.mrb[75].mxu1 }
 0x18f   : > { %v4000_v1 = vadd.f32 %v1869_v39, %v1677_v30 }
 0x192   : > { %v1663_v31 = vpop.f32.mrb[76].mxu0 }
 0x193   : > { %v1678_v44 = vadd.f32 %v1663_v31, %v1475_v54  ;;  %v3107_v47 = vpop.f32.mrb[77].mxu0  ;;  %v1874_v49 = vpop.f32.mrb[76].mxu1 }
 0x194   : > { %v1666_v34 = vpop.f32.mrb[78].mxu0  ;;  %v3143_v37 = vpop.f32.mrb[77].mxu1 }
 0x195   : > { %v1679_v40 = vadd.f32 %v1666_v34, %v1476_v46  ;;  %v4002_v41 = vadd.f32 %v1874_v49, %v1678_v44  ;;  %v3108_v52 = vpop.f32.mrb[79].mxu0  ;;  %v1877_v53 = vpop.f32.mrb[78].mxu1 }
 0x196   : > { %v3144_v55 = vpop.f32.mrb[79].mxu1 }
 0x197   : > { %v4004_v27 = vadd.f32 %v1877_v53, %v1679_v40 }
 0x19a   : > { %v2011_v43 = vpop.f32.mrb[80].mxu0 }
 0x19b   : > { %v2050_v59 = vadd.f32 %v2011_v43, %v1881_v51  ;;  %v3163_v54 = vpop.f32.mrb[81].mxu0  ;;  %v2166_v62 = vpop.f32.mrb[80].mxu1 }
 0x19c   : > { %v2014_v48 = vpop.f32.mrb[82].mxu0  ;;  %v3185_v63 = vpop.f32.mrb[81].mxu1 }
 0x19d   : > { %v2051_v50 = vadd.f32 %v2014_v48, %v1882_v56  ;;  %v2066_v46 = vadd.f32 %v4009_v58, %v2050_v59  ;;  %v3164_v45 = vpop.f32.mrb[83].mxu0  ;;  %v2169_v0 = vpop.f32.mrb[82].mxu1 }
 0x19e   : > { %v3186_v57 = vpop.f32.mrb[83].mxu1 }
 0x19f   : > { %v2205_v4 = vadd.f32 %v2166_v62, %v2066_v46  ;;  %v2067_v6 = vadd.f32 %v4009_v58, %v2051_v50 }
 0x1a1   : > { %v2222_v51 = vadd.f32 %v4015_v2, %v2205_v4  ;;  %v2206_v8 = vadd.f32 %v2169_v0, %v2067_v6 }
 0x1a2   : > { %v2019_v60 = vpop.f32.mrb[84].mxu0 }
 0x1a3   : > { %v2223_v56 = vadd.f32 %v4015_v2, %v2206_v8  ;;  %v2052_v11 = vadd.f32 %v2019_v60, %v1883_v13  ;;  %v3167_v61 = vpop.f32.mrb[85].mxu0  ;;  %v2174_v12 = vpop.f32.mrb[84].mxu1  ;;  %v2232_v3 = vmax.f32 %v2222_v51, 0.0 }
 0x1a4   : > { %v2022_v10 = vpop.f32.mrb[86].mxu0  ;;  %v3189_v14 = vpop.f32.mrb[85].mxu1 }
 0x1a5   : > { %v2233_v19 = vmax.f32 %v2223_v56, 0.0  ;;  %v2053_v20 = vadd.f32 %v2022_v10, %v3992_v5  ;;  %v2068_v7 = vadd.f32 %v4009_v58, %v2052_v11  ;;  %v3168_v21 = vpop.f32.mrb[87].mxu0  ;;  %v2177_v23 = vpop.f32.mrb[86].mxu1 }
 0x1a6   : > { %v3190_v13 = vpop.f32.mrb[87].mxu1 }
 0x1a7   : > { %v2708_v9 = vpack.c.bf16 %v2233_v19, %v2232_v3  ;;  %v2207_v24 = vadd.f32 %v2174_v12, %v2068_v7  ;;  %v2069_v18 = vadd.f32 %v4009_v58, %v2053_v20 }
 0x1a9   : > { %2709 = vst [vmem:[%s4027_s12] sm:$0xff] %v2708_v9   ;;  %v2224_v17 = vadd.f32 %v4015_v2, %v2207_v24  ;;  %v2208_v5 = vadd.f32 %v2177_v23, %v2069_v18 }
 0x1aa   : > { %v2027_v26 = vpop.f32.mrb[88].mxu0 }
 0x1ab   : > { %v2225_v29 = vadd.f32 %v4015_v2, %v2208_v5  ;;  %v2054_v16 = vadd.f32 %v2027_v26, %v3994_v25  ;;  %v3171_v32 = vpop.f32.mrb[89].mxu0  ;;  %v2182_v33 = vpop.f32.mrb[88].mxu1  ;;  %v2234_v36 = vmax.f32 %v2224_v17, 0.0 }
 0x1ac   : > { %v2030_v35 = vpop.f32.mrb[90].mxu0  ;;  %v3193_v22 = vpop.f32.mrb[89].mxu1 }
 0x1ad   : > { %v2235_v30 = vmax.f32 %v2225_v29, 0.0  ;;  %v2055_v38 = vadd.f32 %v2030_v35, %v3996_v15  ;;  %v2070_v39 = vadd.f32 %v4009_v58, %v2054_v16  ;;  %v3172_v42 = vpop.f32.mrb[91].mxu0  ;;  %v2185_v31 = vpop.f32.mrb[90].mxu1 }
 0x1ae   : > { %v3194_v44 = vpop.f32.mrb[91].mxu1 }
 0x1af   : > { %v2713_v47 = vpack.c.bf16 %v2235_v30, %v2234_v36  ;;  %v2209_v49 = vadd.f32 %v2182_v33, %v2070_v39  ;;  %v2071_v34 = vadd.f32 %v4009_v58, %v2055_v38 }
 0x1b1   : > { %2730 = vst [vmem:[%s4027_s12 + $0x8] sm:$0xff] %v2713_v47   ;;  %v2226_v25 = vadd.f32 %v4015_v2, %v2209_v49  ;;  %v2210_v37 = vadd.f32 %v2185_v31, %v2071_v34 }
 0x1b2   : > { %v2035_v40 = vpop.f32.mrb[92].mxu0 }
 0x1b3   : > { %v2227_v52 = vadd.f32 %v4015_v2, %v2210_v37  ;;  %v2056_v53 = vadd.f32 %v2035_v40, %v3998_v28  ;;  %v3175_v15 = vpop.f32.mrb[93].mxu0  ;;  %v2190_v55 = vpop.f32.mrb[92].mxu1  ;;  %v2236_v54 = vmax.f32 %v2226_v25, 0.0 }
 0x1b4   : > { %v2038_v43 = vpop.f32.mrb[94].mxu0  ;;  %v3197_v59 = vpop.f32.mrb[93].mxu1 }
 0x1b5   : > { %v2237_v62 = vmax.f32 %v2227_v52, 0.0  ;;  %v2057_v48 = vadd.f32 %v2038_v43, %v4000_v1  ;;  %v2072_v63 = vadd.f32 %v4009_v58, %v2056_v53  ;;  %v3176_v50 = vpop.f32.mrb[95].mxu0  ;;  %v2193_v46 = vpop.f32.mrb[94].mxu1 }
 0x1b6   : > { %v3198_v45 = vpop.f32.mrb[95].mxu1 }
 0x1b7   : > { %v2718_v0 = vpack.c.bf16 %v2237_v62, %v2236_v54  ;;  %v2211_v57 = vadd.f32 %v2190_v55, %v2072_v63  ;;  %v2073_v4 = vadd.f32 %v4009_v58, %v2057_v48 }
 0x1b9   : > { %2731 = vst [vmem:[%s4027_s12 + $0x10] sm:$0xff] %v2718_v0   ;;  %v2228_v28 = vadd.f32 %v4015_v2, %v2211_v57  ;;  %v2212_v6 = vadd.f32 %v2193_v46, %v2073_v4 }
 0x1ba   : > { %v2043_v51 = vpop.f32.mrb[96].mxu0 }
 0x1bb   : > { %v2229_v8 = vadd.f32 %v4015_v2, %v2212_v6  ;;  %v2058_v60 = vadd.f32 %v2043_v51, %v4002_v41  ;;  %v3179_v1 = vpop.f32.mrb[97].mxu0  ;;  %v2198_v56 = vpop.f32.mrb[96].mxu1  ;;  %v2238_v12 = vmax.f32 %v2228_v28, 0.0 }
 0x1bc   : > { %v2046_v11 = vpop.f32.mrb[98].mxu0  ;;  %v3201_v61 = vpop.f32.mrb[97].mxu1 }
 0x1bd   : > { %v2239_v10 = vmax.f32 %v2229_v8, 0.0  ;;  %v2059_v14 = vadd.f32 %v2046_v11, %v4004_v27  ;;  %v2074_v3 = vadd.f32 %v4009_v58, %v2058_v60  ;;  %v3180_v19 = vpop.f32.mrb[99].mxu0  ;;  %v2201_v20 = vpop.f32.mrb[98].mxu1 }
 0x1be   : > { %v3202_v7 = vpop.f32.mrb[99].mxu1 }
 0x1bf   : > { %v2723_v21 = vpack.c.bf16 %v2239_v10, %v2238_v12  ;;  %v2213_v23 = vadd.f32 %v2198_v56, %v2074_v3  ;;  %v2075_v13 = vadd.f32 %v4009_v58, %v2059_v14 }
 0x1c1   : > { %2732 = vst [vmem:[%s4027_s12 + $0x18] sm:$0xff] %v2723_v21   ;;  %v2230_v41 = vadd.f32 %v4015_v2, %v2213_v23  ;;  %v2214_v9 = vadd.f32 %v2201_v20, %v2075_v13 }
 0x1c3   : > { %v2231_v24 = vadd.f32 %v4015_v2, %v2214_v9  ;;  %v2240_v18 = vmax.f32 %v2230_v41, 0.0 }
 0x1c5   : > { %v2241_v17 = vmax.f32 %v2231_v24, 0.0 }
 0x1c7   : > { %v2728_v5 = vpack.c.bf16 %v2241_v17, %v2240_v18 }
 0x1c9   : > { %2733 = vst [vmem:[%s4027_s12 + $0x20] sm:$0xff] %v2728_v5  }
 0x1ca PF: > { %s16_s23 = sadd.s32 1, %s3353_s23   ;;  %s4071_s21 = smov %s3349_s22 }
 0x1cb   : > { %p13_p5 = scmp.ge.s32.totalorder %s16_s23, 4   ;;  %s4072_s22 = smov %s4074_s24 }
 0x1cd   :  { %15 = sbr.rel (!%p13_p5) target bundleno = 2 (0x2), region = 97 }

</bundles_post_ra>
